<compile_context>
chip_gen: v7x
topology: tpu7x:2x2x1
jax: 0.10.0
libtpu: 0.0.40
codegen_flags: <defaults>
</compile_context>

<pallas_src>
import math
import functools

import jax
import jax.numpy as jnp
from jax.experimental import pallas as pl
from jax.experimental.pallas import tpu as pltpu

_LN_EPS = 1e-5


# ----------------------------- shared layer math -----------------------------

def _residual_layer(h, gamma, beta, w1, w2):
    """One SimpleResidualLayer: LN -> fc1 -> relu -> fc2 -> +residual -> relu.

    h: [TB, H] float32; gamma/beta: [1, H] float32; w1/w2: [H, H] weight dtype.
    """
    # LayerNorm (eps=1e-5, biased variance, affine) -- centered form.
    mean = jnp.mean(h, axis=-1, keepdims=True)
    centered = h - mean
    var = jnp.mean(centered * centered, axis=-1, keepdims=True)
    normed = centered * jax.lax.rsqrt(var + _LN_EPS)
    normed = normed * gamma + beta

    out = jnp.dot(normed.astype(w1.dtype), w1, preferred_element_type=jnp.float32)
    out = jnp.maximum(out, 0.0)
    out = jnp.dot(out.astype(w2.dtype), w2, preferred_element_type=jnp.float32)
    return jnp.maximum(out + h, 0.0)


# ------------------------------ Pallas kernels --------------------------------

def _resident_kernel(x_ref, w_in_ref, gb_ref, w1_ref, w2_ref, o_ref, *, depth):
    """All weights VMEM-resident; grid is batch-only; depth unrolled in-kernel."""
    # Input projection + ReLU (once per batch tile).
    h = jnp.dot(x_ref[...].astype(w_in_ref.dtype), w_in_ref[...],
                preferred_element_type=jnp.float32)
    h = jnp.maximum(h, 0.0)

    def layer(i, h):
        gb = gb_ref[i]                                   # [2, H] f32
        return _residual_layer(h, gb[0:1, :], gb[1:2, :], w1_ref[i], w2_ref[i])

    h = jax.lax.fori_loop(0, depth, layer, h, unroll=True)
    o_ref[...] = h.astype(o_ref.dtype)


def _streamed_kernel(x_ref, w_in_ref, gb_ref, w1_ref, w2_ref, o_ref, h_ref, *,
                     depth):
    """Fallback: depth on the grid, per-layer weights streamed, h in f32 scratch."""
    layer = pl.program_id(1)

    @pl.when(layer == 0)
    def _():
        h0 = jnp.dot(x_ref[...].astype(w_in_ref.dtype), w_in_ref[...],
                     preferred_element_type=jnp.float32)
        h_ref[...] = jnp.maximum(h0, 0.0)

    gb = gb_ref[0]                                       # [2, H] f32
    h_new = _residual_layer(h_ref[...], gb[0:1, :], gb[1:2, :],
                            w1_ref[0], w2_ref[0])
    h_ref[...] = h_new

    @pl.when(layer == depth - 1)
    def _():
        o_ref[...] = h_new.astype(o_ref.dtype)


# ------------------------------ tiling helpers ---------------------------------

def _pick_batch_tile(B):
    if B < 16:
        return B  # single tile; too small to split across cores usefully
    # Largest power-of-two tile that (a) divides B, (b) leaves >= 2 tiles so the
    # "parallel" batch axis actually shards across v7x's 2 TensorCores, and
    # (c) fills the MXU M dimension (<= 256) when the batch is large enough.
    for tb in (256, 128, 64, 32, 16, 8):
        if tb <= B // 2 and B % tb == 0:
            return tb
    return B


def _ceil_to(v, m):
    return -(-v // m) * m


def _padded_block_bytes(shape, dtype):
    """VMEM bytes for one buffer of this block, last two dims padded to (8,128)."""
    shape = tuple(shape)
    if len(shape) < 2:
        shape = (1,) * (2 - len(shape)) + shape
    *lead, r, c = shape
    n = 1
    for d in lead:
        n *= d
    return n * _ceil_to(r, 8) * _ceil_to(c, 128) * jnp.dtype(dtype).itemsize


# --------------------------------- wrapper -------------------------------------

def metadata_encoder_forward(x, w_in, gamma_beta, w1, w2, *, force_streamed=False):
    """x: [B, F]; w_in: [F, H]; gamma_beta: [depth, 2, H]; w1/w2: [depth, H, H]."""
    B, F = x.shape
    H = w_in.shape[1]
    depth = w1.shape[0]
    TB = _pick_batch_tile(B)
    wdt, xdt = w1.dtype, x.dtype

    # Double-buffered VMEM footprint of the resident layout (all weights held as
    # full blocks whose block index never changes, so they are DMA'd only once).
    resident_bytes = 2 * (_padded_block_bytes((TB, F), xdt)
                          + _padded_block_bytes((F, H), wdt)
                          + _padded_block_bytes((depth, 2, H), jnp.float32)
                          + 2 * _padded_block_bytes((depth, H, H), wdt)
                          + _padded_block_bytes((TB, H), xdt))
    use_resident = (not force_streamed) and resident_bytes <= (48 << 20)

    if use_resident:
        vmem_limit = int(min(max(resident_bytes + (4 << 20), 16 << 20), 64 << 20))
        kernel = functools.partial(_resident_kernel, depth=depth)
        return pl.pallas_call(
            kernel,
            out_shape=jax.ShapeDtypeStruct((B, H), x.dtype),
            grid=(B // TB,),
            in_specs=[
                pl.BlockSpec((TB, F), lambda b: (b, 0)),           # x: batch tile
                pl.BlockSpec((F, H), lambda b: (0, 0)),            # w_in: resident
                pl.BlockSpec((depth, 2, H), lambda b: (0, 0, 0)),  # gamma|beta stack
                pl.BlockSpec((depth, H, H), lambda b: (0, 0, 0)),  # w1 stack
                pl.BlockSpec((depth, H, H), lambda b: (0, 0, 0)),  # w2 stack
            ],
            out_specs=pl.BlockSpec((TB, H), lambda b: (b, 0)),
            compiler_params=pltpu.CompilerParams(
                dimension_semantics=("parallel",),
                vmem_limit_bytes=vmem_limit),
        )(x, w_in, gamma_beta, w1, w2)

    # Fallback: stream per-layer weights with depth as an inner "arbitrary" grid
    # axis; the running activation lives in an f32 VMEM scratch accumulator.
    # TODO(synk): for very large H (>= ~2048 f32) also tile the MLP hidden dim
    # (column-tile w1 / row-tile w2 with accumulation) so per-layer blocks fit.
    streamed_bytes = (2 * (_padded_block_bytes((TB, F), xdt)
                           + _padded_block_bytes((F, H), wdt)
                           + _padded_block_bytes((1, 2, H), jnp.float32)
                           + 2 * _padded_block_bytes((1, H, H), wdt)
                           + _padded_block_bytes((TB, H), xdt))
                      + _padded_block_bytes((TB, H), jnp.float32))
    vmem_limit = int(min(max(streamed_bytes + (4 << 20), 16 << 20), 64 << 20))
    kernel = functools.partial(_streamed_kernel, depth=depth)
    return pl.pallas_call(
        kernel,
        out_shape=jax.ShapeDtypeStruct((B, H), x.dtype),
        grid=(B // TB, depth),
        in_specs=[
            pl.BlockSpec((TB, F), lambda b, l: (b, 0)),       # x: per-batch tile
            pl.BlockSpec((F, H), lambda b, l: (0, 0)),        # w_in: resident
            pl.BlockSpec((1, 2, H), lambda b, l: (l, 0, 0)),  # gamma|beta[l]
            pl.BlockSpec((1, H, H), lambda b, l: (l, 0, 0)),  # w1[l] (streamed)
            pl.BlockSpec((1, H, H), lambda b, l: (l, 0, 0)),  # w2[l] (streamed)
        ],
        out_specs=pl.BlockSpec((TB, H), lambda b, l: (b, 0)),
        scratch_shapes=[pltpu.VMEM((TB, H), jnp.float32)],
        compiler_params=pltpu.CompilerParams(
            dimension_semantics=("parallel", "arbitrary"),
            vmem_limit_bytes=vmem_limit),
    )(x, w_in, gamma_beta, w1, w2)


# ----------------------- deterministic weight init ---------------------------

def _trunc_normal_linear(key, in_features, out_features, dtype):
    # PyTorch weight shape is [out, in]; fan_avg = 0.5*(in + out) (symmetric).
    fan_avg = 0.5 * (in_features + out_features)
    std = math.sqrt(1.0 / fan_avg / 10.0)
    w = jax.random.truncated_normal(key, -2.0, 2.0, (in_features, out_features),
                                    dtype=jnp.float32) * std
    return w.astype(dtype)   # stored as [in, out] (transposed vs PyTorch)


def init_params(key, feature_dim, depth, weights_dtype=jnp.bfloat16):
    """bfloat16 weights are the production default (bf16 MXU path, half the
    DMA/VMEM); pass weights_dtype=jnp.float32 for tight testing vs f32 reference."""
    hidden_dim = feature_dim * 2
    keys = jax.random.split(key, 1 + 2 * depth)
    w_in = _trunc_normal_linear(keys[0], feature_dim, hidden_dim, weights_dtype)
    w1 = jnp.stack([_trunc_normal_linear(keys[1 + 2 * d], hidden_dim, hidden_dim,
                                         weights_dtype) for d in range(depth)])
    w2 = jnp.stack([_trunc_normal_linear(keys[2 + 2 * d], hidden_dim, hidden_dim,
                                         weights_dtype) for d in range(depth)])
    # Merged LayerNorm affine params: [:, 0] = gamma (ones), [:, 1] = beta (zeros).
    gamma_beta = jnp.stack([jnp.ones((depth, hidden_dim), jnp.float32),
                            jnp.zeros((depth, hidden_dim), jnp.float32)], axis=1)
    return w_in, gamma_beta, w1, w2


# ------------------------------ reference ------------------------------------

def reference_forward(x, w_in, gamma_beta, w1, w2):
    h = jnp.maximum(x @ w_in.astype(jnp.float32), 0.0)
    for i in range(w1.shape[0]):
        mean = jnp.mean(h, axis=-1, keepdims=True)
        var = jnp.mean((h - mean) ** 2, axis=-1, keepdims=True)
        normed = (h - mean) / jnp.sqrt(var + _LN_EPS)
        normed = normed * gamma_beta[i, 0] + gamma_beta[i, 1]
        out = jnp.maximum(normed @ w1[i].astype(jnp.float32), 0.0)
        out = out @ w2[i].astype(jnp.float32)
        h = jnp.maximum(out + h, 0.0)
    return h


# --------------------------------- main ---------------------------------------

if __name__ == "__main__":
    feature_dim = 64
    depth = 8
    batch = 8

    key = jax.random.PRNGKey(0)
    k_x, k_w = jax.random.split(key)
    x = jax.random.normal(k_x, (batch, feature_dim), dtype=jnp.float32)
    # f32 weights keep the 1e-4 tolerance against the f32 reference; production
    # would use the bfloat16 default of init_params.
    w_in, gamma_beta, w1, w2 = init_params(k_w, feature_dim, depth,
                                           weights_dtype=jnp.float32)

    ref = reference_forward(x, w_in, gamma_beta, w1, w2)

    # Primary path: VMEM-resident weights, depth collapsed into the kernel.
    out = metadata_encoder_forward(x, w_in, gamma_beta, w1, w2)
    out = jax.block_until_ready(out)
    assert out.shape == (batch, 2 * feature_dim)
    assert jnp.allclose(out, ref, atol=1e-4, rtol=1e-4), "resident path mismatch"

    # Exercise the streamed (depth-on-grid) fallback too, so the large-H path
    # stays correct.
    out_s = jax.block_until_ready(
        metadata_encoder_forward(x, w_in, gamma_beta, w1, w2,
                                 force_streamed=True))
    assert jnp.allclose(out_s, ref, atol=1e-4, rtol=1e-4), "streamed path mismatch"

    print("KERNEL_OK")
</pallas_src>

<mosaic_0001>
module attributes {stable_mosaic.version = 11 : i64} {
  func.func @_resident_kernel(%arg0: i32, %arg1: memref<8x64xf32, #tpu.memory_space<vmem>>, %arg2: memref<64x128xf32, #tpu.memory_space<vmem>>, %arg3: memref<8x2x128xf32, #tpu.memory_space<vmem>>, %arg4: memref<8x128x128xf32, #tpu.memory_space<vmem>>, %arg5: memref<8x128x128xf32, #tpu.memory_space<vmem>>, %arg6: memref<8x128xf32, #tpu.memory_space<vmem>>) attributes {dimension_semantics = [#tpu.dimension_semantics<parallel>], iteration_bounds = array<i64: 1>, scalar_prefetch = 0 : i64, scratch_operands = 0 : i64, tpu.core_type = #tpu.core_type<tc>, window_params = [{transform_indices = @transform_0, window_bounds = array<i64: 8, 64>}, {pipeline_mode = #tpu.pipeline_mode<synchronous>, transform_indices = @transform_1, window_bounds = array<i64: 64, 128>}, {pipeline_mode = #tpu.pipeline_mode<synchronous>, transform_indices = @transform_2, window_bounds = array<i64: 8, 2, 128>}, {pipeline_mode = #tpu.pipeline_mode<synchronous>, transform_indices = @transform_3, window_bounds = array<i64: 8, 128, 128>}, {pipeline_mode = #tpu.pipeline_mode<synchronous>, transform_indices = @transform_4, window_bounds = array<i64: 8, 128, 128>}, {transform_indices = @transform_5, window_bounds = array<i64: 8, 128>}]} {
    %c0 = arith.constant 0 : index
    %c0_0 = arith.constant 0 : index
    %0 = vector.load %arg1[%c0, %c0_0] : memref<8x64xf32, #tpu.memory_space<vmem>>, vector<8x64xf32>
    %c0_1 = arith.constant 0 : index
    %c0_2 = arith.constant 0 : index
    %1 = vector.load %arg2[%c0_1, %c0_2] : memref<64x128xf32, #tpu.memory_space<vmem>>, vector<64x128xf32>
    %cst = arith.constant dense<0.000000e+00> : vector<8x128xf32>
    %2 = tpu.matmul %0, %1, %cst {dimension_numbers = #tpu.dot_dimension_numbers<[1], [0], [0], [1], [0, 0, 1, 1], [], []>} : vector<8x64xf32>, vector<64x128xf32>, vector<8x128xf32> -> vector<8x128xf32>
    %cst_3 = arith.constant 0.000000e+00 : f32
    %3 = vector.broadcast %cst_3 : f32 to vector<8x128xf32>
    %4 = arith.maximumf %2, %3 : vector<8x128xf32>
    %c0_i32 = arith.constant 0 : i32
    %5 = arith.index_cast %c0_i32 : i32 to index
    %c0_4 = arith.constant 0 : index
    %c0_5 = arith.constant 0 : index
    %6 = vector.load %arg3[%5, %c0_4, %c0_5] : memref<8x2x128xf32, #tpu.memory_space<vmem>>, vector<1x2x128xf32>
    %7 = vector.shape_cast %6 : vector<1x2x128xf32> to vector<2x128xf32>
    %8 = vector.extract_strided_slice %7 {offsets = [0, 0], sizes = [1, 128], strides = [1, 1]} : vector<2x128xf32> to vector<1x128xf32>
    %9 = vector.extract_strided_slice %7 {offsets = [1, 0], sizes = [1, 128], strides = [1, 1]} : vector<2x128xf32> to vector<1x128xf32>
    %10 = arith.index_cast %c0_i32 : i32 to index
    %c0_6 = arith.constant 0 : index
    %c0_7 = arith.constant 0 : index
    %11 = vector.load %arg4[%10, %c0_6, %c0_7] : memref<8x128x128xf32, #tpu.memory_space<vmem>>, vector<1x128x128xf32>
    %12 = vector.shape_cast %11 : vector<1x128x128xf32> to vector<128x128xf32>
    %13 = arith.index_cast %c0_i32 : i32 to index
    %c0_8 = arith.constant 0 : index
    %c0_9 = arith.constant 0 : index
    %14 = vector.load %arg5[%13, %c0_8, %c0_9] : memref<8x128x128xf32, #tpu.memory_space<vmem>>, vector<1x128x128xf32>
    %15 = vector.shape_cast %14 : vector<1x128x128xf32> to vector<128x128xf32>
    %cst_10 = arith.constant dense<0.000000e+00> : vector<8xf32>
    %16 = vector.multi_reduction <add>, %4, %cst_10 [1] : vector<8x128xf32> to vector<8xf32>
    %17 = vector.shape_cast %16 : vector<8xf32> to vector<8x1xf32>
    %cst_11 = arith.constant 1.280000e+02 : f32
    %18 = vector.broadcast %cst_11 : f32 to vector<8x1xf32>
    %19 = arith.divf %17, %18 : vector<8x1xf32>
    %20 = vector.broadcast %19 : vector<8x1xf32> to vector<8x128xf32>
    %21 = arith.subf %4, %20 : vector<8x128xf32>
    %22 = arith.mulf %21, %21 : vector<8x128xf32>
    %cst_12 = arith.constant dense<0.000000e+00> : vector<8xf32>
    %23 = vector.multi_reduction <add>, %22, %cst_12 [1] : vector<8x128xf32> to vector<8xf32>
    %24 = vector.shape_cast %23 : vector<8xf32> to vector<8x1xf32>
    %cst_13 = arith.constant 1.280000e+02 : f32
    %25 = vector.broadcast %cst_13 : f32 to vector<8x1xf32>
    %26 = arith.divf %24, %25 : vector<8x1xf32>
    %cst_14 = arith.constant 9.99999974E-6 : f32
    %27 = vector.broadcast %cst_14 : f32 to vector<8x1xf32>
    %28 = arith.addf %26, %27 : vector<8x1xf32>
    %29 = math.rsqrt %28 : vector<8x1xf32>
    %30 = vector.broadcast %29 : vector<8x1xf32> to vector<8x128xf32>
    %31 = arith.mulf %21, %30 : vector<8x128xf32>
    %32 = vector.broadcast %8 : vector<1x128xf32> to vector<8x128xf32>
    %33 = arith.mulf %31, %32 : vector<8x128xf32>
    %34 = vector.broadcast %9 : vector<1x128xf32> to vector<8x128xf32>
    %35 = arith.addf %33, %34 : vector<8x128xf32>
    %cst_15 = arith.constant dense<0.000000e+00> : vector<8x128xf32>
    %36 = tpu.matmul %35, %12, %cst_15 {dimension_numbers = #tpu.dot_dimension_numbers<[1], [0], [0], [1], [0, 0, 1, 1], [], []>} : vector<8x128xf32>, vector<128x128xf32>, vector<8x128xf32> -> vector<8x128xf32>
    %cst_16 = arith.constant 0.000000e+00 : f32
    %37 = vector.broadcast %cst_16 : f32 to vector<8x128xf32>
    %38 = arith.maximumf %36, %37 : vector<8x128xf32>
    %cst_17 = arith.constant dense<0.000000e+00> : vector<8x128xf32>
    %39 = tpu.matmul %38, %15, %cst_17 {dimension_numbers = #tpu.dot_dimension_numbers<[1], [0], [0], [1], [0, 0, 1, 1], [], []>} : vector<8x128xf32>, vector<128x128xf32>, vector<8x128xf32> -> vector<8x128xf32>
    %40 = arith.addf %39, %4 : vector<8x128xf32>
    %cst_18 = arith.constant 0.000000e+00 : f32
    %41 = vector.broadcast %cst_18 : f32 to vector<8x128xf32>
    %42 = arith.maximumf %40, %41 : vector<8x128xf32>
    %c1_i32 = arith.constant 1 : i32
    %43 = arith.index_cast %c1_i32 : i32 to index
    %c0_19 = arith.constant 0 : index
    %c0_20 = arith.constant 0 : index
    %44 = vector.load %arg3[%43, %c0_19, %c0_20] : memref<8x2x128xf32, #tpu.memory_space<vmem>>, vector<1x2x128xf32>
    %45 = vector.shape_cast %44 : vector<1x2x128xf32> to vector<2x128xf32>
    %46 = vector.extract_strided_slice %45 {offsets = [0, 0], sizes = [1, 128], strides = [1, 1]} : vector<2x128xf32> to vector<1x128xf32>
    %47 = vector.extract_strided_slice %45 {offsets = [1, 0], sizes = [1, 128], strides = [1, 1]} : vector<2x128xf32> to vector<1x128xf32>
    %48 = arith.index_cast %c1_i32 : i32 to index
    %c0_21 = arith.constant 0 : index
    %c0_22 = arith.constant 0 : index
    %49 = vector.load %arg4[%48, %c0_21, %c0_22] : memref<8x128x128xf32, #tpu.memory_space<vmem>>, vector<1x128x128xf32>
    %50 = vector.shape_cast %49 : vector<1x128x128xf32> to vector<128x128xf32>
    %51 = arith.index_cast %c1_i32 : i32 to index
    %c0_23 = arith.constant 0 : index
    %c0_24 = arith.constant 0 : index
    %52 = vector.load %arg5[%51, %c0_23, %c0_24] : memref<8x128x128xf32, #tpu.memory_space<vmem>>, vector<1x128x128xf32>
    %53 = vector.shape_cast %52 : vector<1x128x128xf32> to vector<128x128xf32>
    %cst_25 = arith.constant dense<0.000000e+00> : vector<8xf32>
    %54 = vector.multi_reduction <add>, %42, %cst_25 [1] : vector<8x128xf32> to vector<8xf32>
    %55 = vector.shape_cast %54 : vector<8xf32> to vector<8x1xf32>
    %cst_26 = arith.constant 1.280000e+02 : f32
    %56 = vector.broadcast %cst_26 : f32 to vector<8x1xf32>
    %57 = arith.divf %55, %56 : vector<8x1xf32>
    %58 = vector.broadcast %57 : vector<8x1xf32> to vector<8x128xf32>
    %59 = arith.subf %42, %58 : vector<8x128xf32>
    %60 = arith.mulf %59, %59 : vector<8x128xf32>
    %cst_27 = arith.constant dense<0.000000e+00> : vector<8xf32>
    %61 = vector.multi_reduction <add>, %60, %cst_27 [1] : vector<8x128xf32> to vector<8xf32>
    %62 = vector.shape_cast %61 : vector<8xf32> to vector<8x1xf32>
    %cst_28 = arith.constant 1.280000e+02 : f32
    %63 = vector.broadcast %cst_28 : f32 to vector<8x1xf32>
    %64 = arith.divf %62, %63 : vector<8x1xf32>
    %cst_29 = arith.constant 9.99999974E-6 : f32
    %65 = vector.broadcast %cst_29 : f32 to vector<8x1xf32>
    %66 = arith.addf %64, %65 : vector<8x1xf32>
    %67 = math.rsqrt %66 : vector<8x1xf32>
    %68 = vector.broadcast %67 : vector<8x1xf32> to vector<8x128xf32>
    %69 = arith.mulf %59, %68 : vector<8x128xf32>
    %70 = vector.broadcast %46 : vector<1x128xf32> to vector<8x128xf32>
    %71 = arith.mulf %69, %70 : vector<8x128xf32>
    %72 = vector.broadcast %47 : vector<1x128xf32> to vector<8x128xf32>
    %73 = arith.addf %71, %72 : vector<8x128xf32>
    %cst_30 = arith.constant dense<0.000000e+00> : vector<8x128xf32>
    %74 = tpu.matmul %73, %50, %cst_30 {dimension_numbers = #tpu.dot_dimension_numbers<[1], [0], [0], [1], [0, 0, 1, 1], [], []>} : vector<8x128xf32>, vector<128x128xf32>, vector<8x128xf32> -> vector<8x128xf32>
    %cst_31 = arith.constant 0.000000e+00 : f32
    %75 = vector.broadcast %cst_31 : f32 to vector<8x128xf32>
    %76 = arith.maximumf %74, %75 : vector<8x128xf32>
    %cst_32 = arith.constant dense<0.000000e+00> : vector<8x128xf32>
    %77 = tpu.matmul %76, %53, %cst_32 {dimension_numbers = #tpu.dot_dimension_numbers<[1], [0], [0], [1], [0, 0, 1, 1], [], []>} : vector<8x128xf32>, vector<128x128xf32>, vector<8x128xf32> -> vector<8x128xf32>
    %78 = arith.addf %77, %42 : vector<8x128xf32>
    %cst_33 = arith.constant 0.000000e+00 : f32
    %79 = vector.broadcast %cst_33 : f32 to vector<8x128xf32>
    %80 = arith.maximumf %78, %79 : vector<8x128xf32>
    %c2_i32 = arith.constant 2 : i32
    %81 = arith.index_cast %c2_i32 : i32 to index
    %c0_34 = arith.constant 0 : index
    %c0_35 = arith.constant 0 : index
    %82 = vector.load %arg3[%81, %c0_34, %c0_35] : memref<8x2x128xf32, #tpu.memory_space<vmem>>, vector<1x2x128xf32>
    %83 = vector.shape_cast %82 : vector<1x2x128xf32> to vector<2x128xf32>
    %84 = vector.extract_strided_slice %83 {offsets = [0, 0], sizes = [1, 128], strides = [1, 1]} : vector<2x128xf32> to vector<1x128xf32>
    %85 = vector.extract_strided_slice %83 {offsets = [1, 0], sizes = [1, 128], strides = [1, 1]} : vector<2x128xf32> to vector<1x128xf32>
    %86 = arith.index_cast %c2_i32 : i32 to index
    %c0_36 = arith.constant 0 : index
    %c0_37 = arith.constant 0 : index
    %87 = vector.load %arg4[%86, %c0_36, %c0_37] : memref<8x128x128xf32, #tpu.memory_space<vmem>>, vector<1x128x128xf32>
    %88 = vector.shape_cast %87 : vector<1x128x128xf32> to vector<128x128xf32>
    %89 = arith.index_cast %c2_i32 : i32 to index
    %c0_38 = arith.constant 0 : index
    %c0_39 = arith.constant 0 : index
    %90 = vector.load %arg5[%89, %c0_38, %c0_39] : memref<8x128x128xf32, #tpu.memory_space<vmem>>, vector<1x128x128xf32>
    %91 = vector.shape_cast %90 : vector<1x128x128xf32> to vector<128x128xf32>
    %cst_40 = arith.constant dense<0.000000e+00> : vector<8xf32>
    %92 = vector.multi_reduction <add>, %80, %cst_40 [1] : vector<8x128xf32> to vector<8xf32>
    %93 = vector.shape_cast %92 : vector<8xf32> to vector<8x1xf32>
    %cst_41 = arith.constant 1.280000e+02 : f32
    %94 = vector.broadcast %cst_41 : f32 to vector<8x1xf32>
    %95 = arith.divf %93, %94 : vector<8x1xf32>
    %96 = vector.broadcast %95 : vector<8x1xf32> to vector<8x128xf32>
    %97 = arith.subf %80, %96 : vector<8x128xf32>
    %98 = arith.mulf %97, %97 : vector<8x128xf32>
    %cst_42 = arith.constant dense<0.000000e+00> : vector<8xf32>
    %99 = vector.multi_reduction <add>, %98, %cst_42 [1] : vector<8x128xf32> to vector<8xf32>
    %100 = vector.shape_cast %99 : vector<8xf32> to vector<8x1xf32>
    %cst_43 = arith.constant 1.280000e+02 : f32
    %101 = vector.broadcast %cst_43 : f32 to vector<8x1xf32>
    %102 = arith.divf %100, %101 : vector<8x1xf32>
    %cst_44 = arith.constant 9.99999974E-6 : f32
    %103 = vector.broadcast %cst_44 : f32 to vector<8x1xf32>
    %104 = arith.addf %102, %103 : vector<8x1xf32>
    %105 = math.rsqrt %104 : vector<8x1xf32>
    %106 = vector.broadcast %105 : vector<8x1xf32> to vector<8x128xf32>
    %107 = arith.mulf %97, %106 : vector<8x128xf32>
    %108 = vector.broadcast %84 : vector<1x128xf32> to vector<8x128xf32>
    %109 = arith.mulf %107, %108 : vector<8x128xf32>
    %110 = vector.broadcast %85 : vector<1x128xf32> to vector<8x128xf32>
    %111 = arith.addf %109, %110 : vector<8x128xf32>
    %cst_45 = arith.constant dense<0.000000e+00> : vector<8x128xf32>
    %112 = tpu.matmul %111, %88, %cst_45 {dimension_numbers = #tpu.dot_dimension_numbers<[1], [0], [0], [1], [0, 0, 1, 1], [], []>} : vector<8x128xf32>, vector<128x128xf32>, vector<8x128xf32> -> vector<8x128xf32>
    %cst_46 = arith.constant 0.000000e+00 : f32
    %113 = vector.broadcast %cst_46 : f32 to vector<8x128xf32>
    %114 = arith.maximumf %112, %113 : vector<8x128xf32>
    %cst_47 = arith.constant dense<0.000000e+00> : vector<8x128xf32>
    %115 = tpu.matmul %114, %91, %cst_47 {dimension_numbers = #tpu.dot_dimension_numbers<[1], [0], [0], [1], [0, 0, 1, 1], [], []>} : vector<8x128xf32>, vector<128x128xf32>, vector<8x128xf32> -> vector<8x128xf32>
    %116 = arith.addf %115, %80 : vector<8x128xf32>
    %cst_48 = arith.constant 0.000000e+00 : f32
    %117 = vector.broadcast %cst_48 : f32 to vector<8x128xf32>
    %118 = arith.maximumf %116, %117 : vector<8x128xf32>
    %c3_i32 = arith.constant 3 : i32
    %119 = arith.index_cast %c3_i32 : i32 to index
    %c0_49 = arith.constant 0 : index
    %c0_50 = arith.constant 0 : index
    %120 = vector.load %arg3[%119, %c0_49, %c0_50] : memref<8x2x128xf32, #tpu.memory_space<vmem>>, vector<1x2x128xf32>
    %121 = vector.shape_cast %120 : vector<1x2x128xf32> to vector<2x128xf32>
    %122 = vector.extract_strided_slice %121 {offsets = [0, 0], sizes = [1, 128], strides = [1, 1]} : vector<2x128xf32> to vector<1x128xf32>
    %123 = vector.extract_strided_slice %121 {offsets = [1, 0], sizes = [1, 128], strides = [1, 1]} : vector<2x128xf32> to vector<1x128xf32>
    %124 = arith.index_cast %c3_i32 : i32 to index
    %c0_51 = arith.constant 0 : index
    %c0_52 = arith.constant 0 : index
    %125 = vector.load %arg4[%124, %c0_51, %c0_52] : memref<8x128x128xf32, #tpu.memory_space<vmem>>, vector<1x128x128xf32>
    %126 = vector.shape_cast %125 : vector<1x128x128xf32> to vector<128x128xf32>
    %127 = arith.index_cast %c3_i32 : i32 to index
    %c0_53 = arith.constant 0 : index
    %c0_54 = arith.constant 0 : index
    %128 = vector.load %arg5[%127, %c0_53, %c0_54] : memref<8x128x128xf32, #tpu.memory_space<vmem>>, vector<1x128x128xf32>
    %129 = vector.shape_cast %128 : vector<1x128x128xf32> to vector<128x128xf32>
    %cst_55 = arith.constant dense<0.000000e+00> : vector<8xf32>
    %130 = vector.multi_reduction <add>, %118, %cst_55 [1] : vector<8x128xf32> to vector<8xf32>
    %131 = vector.shape_cast %130 : vector<8xf32> to vector<8x1xf32>
    %cst_56 = arith.constant 1.280000e+02 : f32
    %132 = vector.broadcast %cst_56 : f32 to vector<8x1xf32>
    %133 = arith.divf %131, %132 : vector<8x1xf32>
    %134 = vector.broadcast %133 : vector<8x1xf32> to vector<8x128xf32>
    %135 = arith.subf %118, %134 : vector<8x128xf32>
    %136 = arith.mulf %135, %135 : vector<8x128xf32>
    %cst_57 = arith.constant dense<0.000000e+00> : vector<8xf32>
    %137 = vector.multi_reduction <add>, %136, %cst_57 [1] : vector<8x128xf32> to vector<8xf32>
    %138 = vector.shape_cast %137 : vector<8xf32> to vector<8x1xf32>
    %cst_58 = arith.constant 1.280000e+02 : f32
    %139 = vector.broadcast %cst_58 : f32 to vector<8x1xf32>
    %140 = arith.divf %138, %139 : vector<8x1xf32>
    %cst_59 = arith.constant 9.99999974E-6 : f32
    %141 = vector.broadcast %cst_59 : f32 to vector<8x1xf32>
    %142 = arith.addf %140, %141 : vector<8x1xf32>
    %143 = math.rsqrt %142 : vector<8x1xf32>
    %144 = vector.broadcast %143 : vector<8x1xf32> to vector<8x128xf32>
    %145 = arith.mulf %135, %144 : vector<8x128xf32>
    %146 = vector.broadcast %122 : vector<1x128xf32> to vector<8x128xf32>
    %147 = arith.mulf %145, %146 : vector<8x128xf32>
    %148 = vector.broadcast %123 : vector<1x128xf32> to vector<8x128xf32>
    %149 = arith.addf %147, %148 : vector<8x128xf32>
    %cst_60 = arith.constant dense<0.000000e+00> : vector<8x128xf32>
    %150 = tpu.matmul %149, %126, %cst_60 {dimension_numbers = #tpu.dot_dimension_numbers<[1], [0], [0], [1], [0, 0, 1, 1], [], []>} : vector<8x128xf32>, vector<128x128xf32>, vector<8x128xf32> -> vector<8x128xf32>
    %cst_61 = arith.constant 0.000000e+00 : f32
    %151 = vector.broadcast %cst_61 : f32 to vector<8x128xf32>
    %152 = arith.maximumf %150, %151 : vector<8x128xf32>
    %cst_62 = arith.constant dense<0.000000e+00> : vector<8x128xf32>
    %153 = tpu.matmul %152, %129, %cst_62 {dimension_numbers = #tpu.dot_dimension_numbers<[1], [0], [0], [1], [0, 0, 1, 1], [], []>} : vector<8x128xf32>, vector<128x128xf32>, vector<8x128xf32> -> vector<8x128xf32>
    %154 = arith.addf %153, %118 : vector<8x128xf32>
    %cst_63 = arith.constant 0.000000e+00 : f32
    %155 = vector.broadcast %cst_63 : f32 to vector<8x128xf32>
    %156 = arith.maximumf %154, %155 : vector<8x128xf32>
    %c4_i32 = arith.constant 4 : i32
    %157 = arith.index_cast %c4_i32 : i32 to index
    %c0_64 = arith.constant 0 : index
    %c0_65 = arith.constant 0 : index
    %158 = vector.load %arg3[%157, %c0_64, %c0_65] : memref<8x2x128xf32, #tpu.memory_space<vmem>>, vector<1x2x128xf32>
    %159 = vector.shape_cast %158 : vector<1x2x128xf32> to vector<2x128xf32>
    %160 = vector.extract_strided_slice %159 {offsets = [0, 0], sizes = [1, 128], strides = [1, 1]} : vector<2x128xf32> to vector<1x128xf32>
    %161 = vector.extract_strided_slice %159 {offsets = [1, 0], sizes = [1, 128], strides = [1, 1]} : vector<2x128xf32> to vector<1x128xf32>
    %162 = arith.index_cast %c4_i32 : i32 to index
    %c0_66 = arith.constant 0 : index
    %c0_67 = arith.constant 0 : index
    %163 = vector.load %arg4[%162, %c0_66, %c0_67] : memref<8x128x128xf32, #tpu.memory_space<vmem>>, vector<1x128x128xf32>
    %164 = vector.shape_cast %163 : vector<1x128x128xf32> to vector<128x128xf32>
    %165 = arith.index_cast %c4_i32 : i32 to index
    %c0_68 = arith.constant 0 : index
    %c0_69 = arith.constant 0 : index
    %166 = vector.load %arg5[%165, %c0_68, %c0_69] : memref<8x128x128xf32, #tpu.memory_space<vmem>>, vector<1x128x128xf32>
    %167 = vector.shape_cast %166 : vector<1x128x128xf32> to vector<128x128xf32>
    %cst_70 = arith.constant dense<0.000000e+00> : vector<8xf32>
    %168 = vector.multi_reduction <add>, %156, %cst_70 [1] : vector<8x128xf32> to vector<8xf32>
    %169 = vector.shape_cast %168 : vector<8xf32> to vector<8x1xf32>
    %cst_71 = arith.constant 1.280000e+02 : f32
    %170 = vector.broadcast %cst_71 : f32 to vector<8x1xf32>
    %171 = arith.divf %169, %170 : vector<8x1xf32>
    %172 = vector.broadcast %171 : vector<8x1xf32> to vector<8x128xf32>
    %173 = arith.subf %156, %172 : vector<8x128xf32>
    %174 = arith.mulf %173, %173 : vector<8x128xf32>
    %cst_72 = arith.constant dense<0.000000e+00> : vector<8xf32>
    %175 = vector.multi_reduction <add>, %174, %cst_72 [1] : vector<8x128xf32> to vector<8xf32>
    %176 = vector.shape_cast %175 : vector<8xf32> to vector<8x1xf32>
    %cst_73 = arith.constant 1.280000e+02 : f32
    %177 = vector.broadcast %cst_73 : f32 to vector<8x1xf32>
    %178 = arith.divf %176, %177 : vector<8x1xf32>
    %cst_74 = arith.constant 9.99999974E-6 : f32
    %179 = vector.broadcast %cst_74 : f32 to vector<8x1xf32>
    %180 = arith.addf %178, %179 : vector<8x1xf32>
    %181 = math.rsqrt %180 : vector<8x1xf32>
    %182 = vector.broadcast %181 : vector<8x1xf32> to vector<8x128xf32>
    %183 = arith.mulf %173, %182 : vector<8x128xf32>
    %184 = vector.broadcast %160 : vector<1x128xf32> to vector<8x128xf32>
    %185 = arith.mulf %183, %184 : vector<8x128xf32>
    %186 = vector.broadcast %161 : vector<1x128xf32> to vector<8x128xf32>
    %187 = arith.addf %185, %186 : vector<8x128xf32>
    %cst_75 = arith.constant dense<0.000000e+00> : vector<8x128xf32>
    %188 = tpu.matmul %187, %164, %cst_75 {dimension_numbers = #tpu.dot_dimension_numbers<[1], [0], [0], [1], [0, 0, 1, 1], [], []>} : vector<8x128xf32>, vector<128x128xf32>, vector<8x128xf32> -> vector<8x128xf32>
    %cst_76 = arith.constant 0.000000e+00 : f32
    %189 = vector.broadcast %cst_76 : f32 to vector<8x128xf32>
    %190 = arith.maximumf %188, %189 : vector<8x128xf32>
    %cst_77 = arith.constant dense<0.000000e+00> : vector<8x128xf32>
    %191 = tpu.matmul %190, %167, %cst_77 {dimension_numbers = #tpu.dot_dimension_numbers<[1], [0], [0], [1], [0, 0, 1, 1], [], []>} : vector<8x128xf32>, vector<128x128xf32>, vector<8x128xf32> -> vector<8x128xf32>
    %192 = arith.addf %191, %156 : vector<8x128xf32>
    %cst_78 = arith.constant 0.000000e+00 : f32
    %193 = vector.broadcast %cst_78 : f32 to vector<8x128xf32>
    %194 = arith.maximumf %192, %193 : vector<8x128xf32>
    %c5_i32 = arith.constant 5 : i32
    %195 = arith.index_cast %c5_i32 : i32 to index
    %c0_79 = arith.constant 0 : index
    %c0_80 = arith.constant 0 : index
    %196 = vector.load %arg3[%195, %c0_79, %c0_80] : memref<8x2x128xf32, #tpu.memory_space<vmem>>, vector<1x2x128xf32>
    %197 = vector.shape_cast %196 : vector<1x2x128xf32> to vector<2x128xf32>
    %198 = vector.extract_strided_slice %197 {offsets = [0, 0], sizes = [1, 128], strides = [1, 1]} : vector<2x128xf32> to vector<1x128xf32>
    %199 = vector.extract_strided_slice %197 {offsets = [1, 0], sizes = [1, 128], strides = [1, 1]} : vector<2x128xf32> to vector<1x128xf32>
    %200 = arith.index_cast %c5_i32 : i32 to index
    %c0_81 = arith.constant 0 : index
    %c0_82 = arith.constant 0 : index
    %201 = vector.load %arg4[%200, %c0_81, %c0_82] : memref<8x128x128xf32, #tpu.memory_space<vmem>>, vector<1x128x128xf32>
    %202 = vector.shape_cast %201 : vector<1x128x128xf32> to vector<128x128xf32>
    %203 = arith.index_cast %c5_i32 : i32 to index
    %c0_83 = arith.constant 0 : index
    %c0_84 = arith.constant 0 : index
    %204 = vector.load %arg5[%203, %c0_83, %c0_84] : memref<8x128x128xf32, #tpu.memory_space<vmem>>, vector<1x128x128xf32>
    %205 = vector.shape_cast %204 : vector<1x128x128xf32> to vector<128x128xf32>
    %cst_85 = arith.constant dense<0.000000e+00> : vector<8xf32>
    %206 = vector.multi_reduction <add>, %194, %cst_85 [1] : vector<8x128xf32> to vector<8xf32>
    %207 = vector.shape_cast %206 : vector<8xf32> to vector<8x1xf32>
    %cst_86 = arith.constant 1.280000e+02 : f32
    %208 = vector.broadcast %cst_86 : f32 to vector<8x1xf32>
    %209 = arith.divf %207, %208 : vector<8x1xf32>
    %210 = vector.broadcast %209 : vector<8x1xf32> to vector<8x128xf32>
    %211 = arith.subf %194, %210 : vector<8x128xf32>
    %212 = arith.mulf %211, %211 : vector<8x128xf32>
    %cst_87 = arith.constant dense<0.000000e+00> : vector<8xf32>
    %213 = vector.multi_reduction <add>, %212, %cst_87 [1] : vector<8x128xf32> to vector<8xf32>
    %214 = vector.shape_cast %213 : vector<8xf32> to vector<8x1xf32>
    %cst_88 = arith.constant 1.280000e+02 : f32
    %215 = vector.broadcast %cst_88 : f32 to vector<8x1xf32>
    %216 = arith.divf %214, %215 : vector<8x1xf32>
    %cst_89 = arith.constant 9.99999974E-6 : f32
    %217 = vector.broadcast %cst_89 : f32 to vector<8x1xf32>
    %218 = arith.addf %216, %217 : vector<8x1xf32>
    %219 = math.rsqrt %218 : vector<8x1xf32>
    %220 = vector.broadcast %219 : vector<8x1xf32> to vector<8x128xf32>
    %221 = arith.mulf %211, %220 : vector<8x128xf32>
    %222 = vector.broadcast %198 : vector<1x128xf32> to vector<8x128xf32>
    %223 = arith.mulf %221, %222 : vector<8x128xf32>
    %224 = vector.broadcast %199 : vector<1x128xf32> to vector<8x128xf32>
    %225 = arith.addf %223, %224 : vector<8x128xf32>
    %cst_90 = arith.constant dense<0.000000e+00> : vector<8x128xf32>
    %226 = tpu.matmul %225, %202, %cst_90 {dimension_numbers = #tpu.dot_dimension_numbers<[1], [0], [0], [1], [0, 0, 1, 1], [], []>} : vector<8x128xf32>, vector<128x128xf32>, vector<8x128xf32> -> vector<8x128xf32>
    %cst_91 = arith.constant 0.000000e+00 : f32
    %227 = vector.broadcast %cst_91 : f32 to vector<8x128xf32>
    %228 = arith.maximumf %226, %227 : vector<8x128xf32>
    %cst_92 = arith.constant dense<0.000000e+00> : vector<8x128xf32>
    %229 = tpu.matmul %228, %205, %cst_92 {dimension_numbers = #tpu.dot_dimension_numbers<[1], [0], [0], [1], [0, 0, 1, 1], [], []>} : vector<8x128xf32>, vector<128x128xf32>, vector<8x128xf32> -> vector<8x128xf32>
    %230 = arith.addf %229, %194 : vector<8x128xf32>
    %cst_93 = arith.constant 0.000000e+00 : f32
    %231 = vector.broadcast %cst_93 : f32 to vector<8x128xf32>
    %232 = arith.maximumf %230, %231 : vector<8x128xf32>
    %c6_i32 = arith.constant 6 : i32
    %233 = arith.index_cast %c6_i32 : i32 to index
    %c0_94 = arith.constant 0 : index
    %c0_95 = arith.constant 0 : index
    %234 = vector.load %arg3[%233, %c0_94, %c0_95] : memref<8x2x128xf32, #tpu.memory_space<vmem>>, vector<1x2x128xf32>
    %235 = vector.shape_cast %234 : vector<1x2x128xf32> to vector<2x128xf32>
    %236 = vector.extract_strided_slice %235 {offsets = [0, 0], sizes = [1, 128], strides = [1, 1]} : vector<2x128xf32> to vector<1x128xf32>
    %237 = vector.extract_strided_slice %235 {offsets = [1, 0], sizes = [1, 128], strides = [1, 1]} : vector<2x128xf32> to vector<1x128xf32>
    %238 = arith.index_cast %c6_i32 : i32 to index
    %c0_96 = arith.constant 0 : index
    %c0_97 = arith.constant 0 : index
    %239 = vector.load %arg4[%238, %c0_96, %c0_97] : memref<8x128x128xf32, #tpu.memory_space<vmem>>, vector<1x128x128xf32>
    %240 = vector.shape_cast %239 : vector<1x128x128xf32> to vector<128x128xf32>
    %241 = arith.index_cast %c6_i32 : i32 to index
    %c0_98 = arith.constant 0 : index
    %c0_99 = arith.constant 0 : index
    %242 = vector.load %arg5[%241, %c0_98, %c0_99] : memref<8x128x128xf32, #tpu.memory_space<vmem>>, vector<1x128x128xf32>
    %243 = vector.shape_cast %242 : vector<1x128x128xf32> to vector<128x128xf32>
    %cst_100 = arith.constant dense<0.000000e+00> : vector<8xf32>
    %244 = vector.multi_reduction <add>, %232, %cst_100 [1] : vector<8x128xf32> to vector<8xf32>
    %245 = vector.shape_cast %244 : vector<8xf32> to vector<8x1xf32>
    %cst_101 = arith.constant 1.280000e+02 : f32
    %246 = vector.broadcast %cst_101 : f32 to vector<8x1xf32>
    %247 = arith.divf %245, %246 : vector<8x1xf32>
    %248 = vector.broadcast %247 : vector<8x1xf32> to vector<8x128xf32>
    %249 = arith.subf %232, %248 : vector<8x128xf32>
    %250 = arith.mulf %249, %249 : vector<8x128xf32>
    %cst_102 = arith.constant dense<0.000000e+00> : vector<8xf32>
    %251 = vector.multi_reduction <add>, %250, %cst_102 [1] : vector<8x128xf32> to vector<8xf32>
    %252 = vector.shape_cast %251 : vector<8xf32> to vector<8x1xf32>
    %cst_103 = arith.constant 1.280000e+02 : f32
    %253 = vector.broadcast %cst_103 : f32 to vector<8x1xf32>
    %254 = arith.divf %252, %253 : vector<8x1xf32>
    %cst_104 = arith.constant 9.99999974E-6 : f32
    %255 = vector.broadcast %cst_104 : f32 to vector<8x1xf32>
    %256 = arith.addf %254, %255 : vector<8x1xf32>
    %257 = math.rsqrt %256 : vector<8x1xf32>
    %258 = vector.broadcast %257 : vector<8x1xf32> to vector<8x128xf32>
    %259 = arith.mulf %249, %258 : vector<8x128xf32>
    %260 = vector.broadcast %236 : vector<1x128xf32> to vector<8x128xf32>
    %261 = arith.mulf %259, %260 : vector<8x128xf32>
    %262 = vector.broadcast %237 : vector<1x128xf32> to vector<8x128xf32>
    %263 = arith.addf %261, %262 : vector<8x128xf32>
    %cst_105 = arith.constant dense<0.000000e+00> : vector<8x128xf32>
    %264 = tpu.matmul %263, %240, %cst_105 {dimension_numbers = #tpu.dot_dimension_numbers<[1], [0], [0], [1], [0, 0, 1, 1], [], []>} : vector<8x128xf32>, vector<128x128xf32>, vector<8x128xf32> -> vector<8x128xf32>
    %cst_106 = arith.constant 0.000000e+00 : f32
    %265 = vector.broadcast %cst_106 : f32 to vector<8x128xf32>
    %266 = arith.maximumf %264, %265 : vector<8x128xf32>
    %cst_107 = arith.constant dense<0.000000e+00> : vector<8x128xf32>
    %267 = tpu.matmul %266, %243, %cst_107 {dimension_numbers = #tpu.dot_dimension_numbers<[1], [0], [0], [1], [0, 0, 1, 1], [], []>} : vector<8x128xf32>, vector<128x128xf32>, vector<8x128xf32> -> vector<8x128xf32>
    %268 = arith.addf %267, %232 : vector<8x128xf32>
    %cst_108 = arith.constant 0.000000e+00 : f32
    %269 = vector.broadcast %cst_108 : f32 to vector<8x128xf32>
    %270 = arith.maximumf %268, %269 : vector<8x128xf32>
    %c7_i32 = arith.constant 7 : i32
    %271 = arith.index_cast %c7_i32 : i32 to index
    %c0_109 = arith.constant 0 : index
    %c0_110 = arith.constant 0 : index
    %272 = vector.load %arg3[%271, %c0_109, %c0_110] : memref<8x2x128xf32, #tpu.memory_space<vmem>>, vector<1x2x128xf32>
    %273 = vector.shape_cast %272 : vector<1x2x128xf32> to vector<2x128xf32>
    %274 = vector.extract_strided_slice %273 {offsets = [0, 0], sizes = [1, 128], strides = [1, 1]} : vector<2x128xf32> to vector<1x128xf32>
    %275 = vector.extract_strided_slice %273 {offsets = [1, 0], sizes = [1, 128], strides = [1, 1]} : vector<2x128xf32> to vector<1x128xf32>
    %276 = arith.index_cast %c7_i32 : i32 to index
    %c0_111 = arith.constant 0 : index
    %c0_112 = arith.constant 0 : index
    %277 = vector.load %arg4[%276, %c0_111, %c0_112] : memref<8x128x128xf32, #tpu.memory_space<vmem>>, vector<1x128x128xf32>
    %278 = vector.shape_cast %277 : vector<1x128x128xf32> to vector<128x128xf32>
    %279 = arith.index_cast %c7_i32 : i32 to index
    %c0_113 = arith.constant 0 : index
    %c0_114 = arith.constant 0 : index
    %280 = vector.load %arg5[%279, %c0_113, %c0_114] : memref<8x128x128xf32, #tpu.memory_space<vmem>>, vector<1x128x128xf32>
    %281 = vector.shape_cast %280 : vector<1x128x128xf32> to vector<128x128xf32>
    %cst_115 = arith.constant dense<0.000000e+00> : vector<8xf32>
    %282 = vector.multi_reduction <add>, %270, %cst_115 [1] : vector<8x128xf32> to vector<8xf32>
    %283 = vector.shape_cast %282 : vector<8xf32> to vector<8x1xf32>
    %cst_116 = arith.constant 1.280000e+02 : f32
    %284 = vector.broadcast %cst_116 : f32 to vector<8x1xf32>
    %285 = arith.divf %283, %284 : vector<8x1xf32>
    %286 = vector.broadcast %285 : vector<8x1xf32> to vector<8x128xf32>
    %287 = arith.subf %270, %286 : vector<8x128xf32>
    %288 = arith.mulf %287, %287 : vector<8x128xf32>
    %cst_117 = arith.constant dense<0.000000e+00> : vector<8xf32>
    %289 = vector.multi_reduction <add>, %288, %cst_117 [1] : vector<8x128xf32> to vector<8xf32>
    %290 = vector.shape_cast %289 : vector<8xf32> to vector<8x1xf32>
    %cst_118 = arith.constant 1.280000e+02 : f32
    %291 = vector.broadcast %cst_118 : f32 to vector<8x1xf32>
    %292 = arith.divf %290, %291 : vector<8x1xf32>
    %cst_119 = arith.constant 9.99999974E-6 : f32
    %293 = vector.broadcast %cst_119 : f32 to vector<8x1xf32>
    %294 = arith.addf %292, %293 : vector<8x1xf32>
    %295 = math.rsqrt %294 : vector<8x1xf32>
    %296 = vector.broadcast %295 : vector<8x1xf32> to vector<8x128xf32>
    %297 = arith.mulf %287, %296 : vector<8x128xf32>
    %298 = vector.broadcast %274 : vector<1x128xf32> to vector<8x128xf32>
    %299 = arith.mulf %297, %298 : vector<8x128xf32>
    %300 = vector.broadcast %275 : vector<1x128xf32> to vector<8x128xf32>
    %301 = arith.addf %299, %300 : vector<8x128xf32>
    %cst_120 = arith.constant dense<0.000000e+00> : vector<8x128xf32>
    %302 = tpu.matmul %301, %278, %cst_120 {dimension_numbers = #tpu.dot_dimension_numbers<[1], [0], [0], [1], [0, 0, 1, 1], [], []>} : vector<8x128xf32>, vector<128x128xf32>, vector<8x128xf32> -> vector<8x128xf32>
    %cst_121 = arith.constant 0.000000e+00 : f32
    %303 = vector.broadcast %cst_121 : f32 to vector<8x128xf32>
    %304 = arith.maximumf %302, %303 : vector<8x128xf32>
    %cst_122 = arith.constant dense<0.000000e+00> : vector<8x128xf32>
    %305 = tpu.matmul %304, %281, %cst_122 {dimension_numbers = #tpu.dot_dimension_numbers<[1], [0], [0], [1], [0, 0, 1, 1], [], []>} : vector<8x128xf32>, vector<128x128xf32>, vector<8x128xf32> -> vector<8x128xf32>
    %306 = arith.addf %305, %270 : vector<8x128xf32>
    %cst_123 = arith.constant 0.000000e+00 : f32
    %307 = vector.broadcast %cst_123 : f32 to vector<8x128xf32>
    %308 = arith.maximumf %306, %307 : vector<8x128xf32>
    %c8_i32 = arith.constant 8 : i32
    %c0_124 = arith.constant 0 : index
    %c0_125 = arith.constant 0 : index
    %309 = vector.load %arg6[%c0_124, %c0_125] : memref<8x128xf32, #tpu.memory_space<vmem>>, vector<8x128xf32>
    tpu.vector_store %arg6[%c0_124, %c0_125], %308 {strides = array<i32>} : memref<8x128xf32, #tpu.memory_space<vmem>>, vector<8x128xf32>,
    return
  }
  func.func @transform_0(%arg0: i32) -> (i32, i32) {
    %c0_i32 = arith.constant 0 : i32
    %c0_i32_0 = arith.constant 0 : i32
    return %arg0, %c0_i32 : i32, i32
  }
  func.func @transform_1(%arg0: i32) -> (i32, i32) {
    %c0_i32 = arith.constant 0 : i32
    %c0_i32_0 = arith.constant 0 : i32
    %c0_i32_1 = arith.constant 0 : i32
    return %c0_i32, %c0_i32_0 : i32, i32
  }
  func.func @transform_2(%arg0: i32) -> (i32, i32, i32) {
    %c0_i32 = arith.constant 0 : i32
    %c0_i32_0 = arith.constant 0 : i32
    %c0_i32_1 = arith.constant 0 : i32
    %c0_i32_2 = arith.constant 0 : i32
    return %c0_i32, %c0_i32_0, %c0_i32_1 : i32, i32, i32
  }
  func.func @transform_3(%arg0: i32) -> (i32, i32, i32) {
    %c0_i32 = arith.constant 0 : i32
    %c0_i32_0 = arith.constant 0 : i32
    %c0_i32_1 = arith.constant 0 : i32
    %c0_i32_2 = arith.constant 0 : i32
    return %c0_i32, %c0_i32_0, %c0_i32_1 : i32, i32, i32
  }
  func.func @transform_4(%arg0: i32) -> (i32, i32, i32) {
    %c0_i32 = arith.constant 0 : i32
    %c0_i32_0 = arith.constant 0 : i32
    %c0_i32_1 = arith.constant 0 : i32
    %c0_i32_2 = arith.constant 0 : i32
    return %c0_i32, %c0_i32_0, %c0_i32_1 : i32, i32, i32
  }
  func.func @transform_5(%arg0: i32) -> (i32, i32) {
    %c0_i32 = arith.constant 0 : i32
    %c0_i32_0 = arith.constant 0 : i32
    return %arg0, %c0_i32 : i32, i32
  }
}

</mosaic_0001>

<bundles_post_ra>
// kernel: tpu_custom_call.1
= control target key start
LH: loop header
LB: loop body
LE: loop exit
PB: predicated region body
PF: predicated region fallthrough
CT: control target
= control target key end

     0   :  { %10 = vsyncpa [#allocation3], 0  ;;  %s3595_s0 = inlined_call_operand.hbm [shape: f32[8,64], index: 0, kind: input, shape index: {}]   ;;  %s3596_s1 = inlined_call_operand.hbm [shape: f32[64,128], index: 1, kind: input, shape index: {}]   ;;  %s3597_s2 = inlined_call_operand.hbm [shape: f32[8,2,128], index: 2, kind: input, shape index: {}]   ;;  %s3598_s3 = inlined_call_operand.hbm [shape: f32[8,128,128], index: 3, kind: input, shape index: {}]   ;;  %s3599_s4 = inlined_call_operand.hbm [shape: f32[8,128,128], index: 4, kind: input, shape index: {}]   ;;  %s3600_s5 = inlined_call_operand.hbm [shape: f32[8,128], index: 5, kind: output, shape index: {}]  }
   0x1   :  { %11 = vsyncpa [#allocation6], 0 }
   0x2   :  { %12 = vsyncpa [#allocation9], 0 }
   0x3   :  { %13 = vsyncpa [#allocation4], 0  ;;  %s3205_s18 = smov [#allocation5]   ;;  %s3065_s22 = scalar_lea.hbm %s3596_s1, 1024 }
   0x4   :  { %s29_s19 = sshll.u32 %s3205_s18, 4  ;;  %p3066_p0 = scmp.ne.s32.totalorder %s3596_s1, %s3065_s22  ;;  %s30_s19 = int_to_ptr.vmem [resolvable:$true] %s29_s19 }
   0x5   :  { %p3069_p1 = scmp.lt.u32.totalorder %s3065_s22, %s3596_s1 }
   0x7   :  { %p3071_p2 = pnand %p3069_p1, %p3066_p0 }
   0x9   :  { %3074 = shalt.err (!%p3071_p2)
}
   0xa   :  { %s3075_s27 = scalar_lea.vmem %s30_s19, 1024  ;;  %p3080_p4 = scmp.lt.s32.totalorder %s30_s19, %s30_s19 }
   0xb   :  { %p3076_p3 = scmp.ne.s32.totalorder %s30_s19, %s3075_s27  ;;  %p3081_p5 = scmp.lt.s32.totalorder %s3075_s27, %s3075_s27 }
   0xd   :  { %p3082_p6 = por %p3081_p5, %p3080_p4 }
   0xf   :  { %p3083_p7 = pnand %p3082_p6, %p3076_p3 }
  0x11   :  { %3086 = shalt.err (!%p3083_p7)
}
  0x12   :  { %s3206_s28 = smov 128   ;;  %s3207_s29 = smov 8  }
  0x13   :  { %35 = dma.hbm_to_vmem [thread:$0]  %s3596_s1, 1024, %s30_s19, [#allocation6], %s3206_s28, %s3206_s28, %s3207_s29  }
  0x14   :  { %s3208_s7 = smov [#allocation8]   ;;  %s3209_s9 = smov [#allocation2]  }
  0x15   :  { %s53_s8 = sshll.u32 %s3208_s7, 4  ;;  %s20_s10 = sshll.u32 %s3209_s9, 4  ;;  %s54_s8 = int_to_ptr.vmem [resolvable:$true] %s53_s8  ;;  %s21_s10 = int_to_ptr.vmem [resolvable:$true] %s20_s10 }
  0x16   :  { %s3087_s13 = scalar_lea.hbm %s3598_s3, 16384 }
  0x17   :  { %p3088_p8 = scmp.ne.s32.totalorder %s3598_s3, %s3087_s13  ;;  %p3091_p9 = scmp.lt.u32.totalorder %s3087_s13, %s3598_s3 }
  0x19   :  { %p3093_p10 = pnand %p3091_p9, %p3088_p8 }
  0x1b   :  { %3096 = shalt.err (!%p3093_p10)
}
  0x1c   :  { %s3097_s1 = scalar_lea.vmem %s54_s8, 16384  ;;  %p3102_p12 = scmp.lt.s32.totalorder %s54_s8, %s54_s8 }
  0x1d   :  { %p3098_p11 = scmp.ne.s32.totalorder %s54_s8, %s3097_s1  ;;  %p3103_p13 = scmp.lt.s32.totalorder %s3097_s1, %s3097_s1 }
  0x1f   :  { %p3104_p0 = por %p3103_p13, %p3102_p12 }
  0x21   :  { %p3105_p1 = pnand %p3104_p0, %p3098_p11 }
  0x23   :  { %3108 = shalt.err (!%p3105_p1)
}
  0x24   :  { %59 = dma.hbm_to_vmem [thread:$0]  %s3598_s3, 16384, %s54_s8, [#allocation9], %s3206_s28, %s3206_s28, %s3207_s29  }
  0x25   :  { %s3109_s22 = scalar_lea.hbm %s3595_s0, 128 }
  0x26   :  { %p3110_p2 = scmp.ne.s32.totalorder %s3595_s0, %s3109_s22  ;;  %p3113_p3 = scmp.lt.u32.totalorder %s3109_s22, %s3595_s0 }
  0x28   :  { %p3115_p4 = pnand %p3113_p3, %p3110_p2 }
  0x2a   :  { %3118 = shalt.err (!%p3115_p4)
}
  0x2b   :  { %s3119_s27 = scalar_lea.vmem %s21_s10, 128  ;;  %p3124_p6 = scmp.lt.s32.totalorder %s21_s10, %s21_s10 }
  0x2c   :  { %p3120_p5 = scmp.ne.s32.totalorder %s21_s10, %s3119_s27  ;;  %p3125_p7 = scmp.lt.s32.totalorder %s3119_s27, %s3119_s27 }
  0x2e   :  { %p3126_p8 = por %p3125_p7, %p3124_p6 }
  0x30   :  { %p3127_p9 = pnand %p3126_p8, %p3120_p5 }
  0x32   :  { %3130 = shalt.err (!%p3127_p9)
}
  0x33   :  { %23 = dma.hbm_to_vmem [thread:$0]  %s3595_s0, 128, %s21_s10, [#allocation3]  }
  0x34   :  { %s3210_s6 = smov [#allocation7]   ;;  %s3131_s11 = scalar_lea.hbm %s3597_s2, 256 }
  0x35   :  { %s41_s7 = sshll.u32 %s3210_s6, 4  ;;  %p3132_p10 = scmp.ne.s32.totalorder %s3597_s2, %s3131_s11  ;;  %s42_s7 = int_to_ptr.vmem [resolvable:$true] %s41_s7 }
  0x36   :  { %p3135_p11 = scmp.lt.u32.totalorder %s3131_s11, %s3597_s2 }
  0x38   :  { %p3137_p12 = pnand %p3135_p11, %p3132_p10 }
  0x3a   :  { %3140 = shalt.err (!%p3137_p12)
}
  0x3b   :  { %s3141_s16 = scalar_lea.vmem %s42_s7, 256  ;;  %p3146_p0 = scmp.lt.s32.totalorder %s42_s7, %s42_s7 }
  0x3c   :  { %p3142_p13 = scmp.ne.s32.totalorder %s42_s7, %s3141_s16  ;;  %p3147_p1 = scmp.lt.s32.totalorder %s3141_s16, %s3141_s16 }
  0x3e   :  { %p3148_p2 = por %p3147_p1, %p3146_p0 }
  0x40   :  { %p3149_p3 = pnand %p3148_p2, %p3142_p13 }
  0x42   :  { %3152 = shalt.err (!%p3149_p3)
}
  0x43   :  { %s3211_s0 = smov 32   ;;  %s3212_s10 = smov 2  }
  0x44   :  { %47 = dma.hbm_to_vmem [thread:$0]  %s3597_s2, 256, %s42_s7, [#allocation6], %s3211_s0, %s3211_s0, %s3212_s10  }
  0x45   :  { %s3213_s18 = smov [#allocation10]   ;;  %s3153_s22 = scalar_lea.hbm %s3599_s4, 16384 }
  0x46   :  { %s65_s19 = sshll.u32 %s3213_s18, 4  ;;  %p3154_p4 = scmp.ne.s32.totalorder %s3599_s4, %s3153_s22  ;;  %s66_s19 = int_to_ptr.vmem [resolvable:$true] %s65_s19 }
  0x47   :  { %p3157_p5 = scmp.lt.u32.totalorder %s3153_s22, %s3599_s4 }
  0x49   :  { %p3159_p6 = pnand %p3157_p5, %p3154_p4 }
  0x4b   :  { %3162 = shalt.err (!%p3159_p6)
}
  0x4c   :  { %s3163_s27 = scalar_lea.vmem %s66_s19, 16384  ;;  %p3168_p8 = scmp.lt.s32.totalorder %s66_s19, %s66_s19 }
  0x4d   :  { %p3164_p7 = scmp.ne.s32.totalorder %s66_s19, %s3163_s27  ;;  %p3169_p9 = scmp.lt.s32.totalorder %s3163_s27, %s3163_s27 }
  0x4f   :  { %p3170_p10 = por %p3169_p9, %p3168_p8 }
  0x51   :  { %p3171_p11 = pnand %p3170_p10, %p3164_p7 }
  0x53   :  { %3174 = shalt.err (!%p3171_p11)
}
  0x54   :  { %71 = dma.hbm_to_vmem [thread:$0]  %s3599_s4, 16384, %s66_s19, [#allocation9], %s3206_s28, %s3206_s28, %s3207_s29  }
  0x55   :  { %3197 = dma.done.wait [#allocation3], 128  }
  0x56   :  { %3198 = vsyncadd [#allocation3], 4294967168 }
  0x57   :  { %3199 = dma.done.wait [#allocation6], 1280  }
  0x58   :  { %3200 = vsyncadd [#allocation6], 4294966016 }
  0x59   :  { %3201 = dma.done.wait [#allocation9], 32768  }
  0x5a   :  { %3202 = vsyncadd [#allocation9], 4294934528  ;;  %v3214_v0 = vmov 0.0|0.0   ;;  %vm3215_vm0 = vmmov 0   ;;  %v3216_v1 = vmov 0.0   ;;  %v88_v2 = vld [vmem:[#allocation5] sm:$0xff] }
  0x5b   :  { %2640 = vmatprep.subr.bf16.mxu0 %v3214_v0  ;;  %2077 = vmatprep.mubr.msk.f32.mxu0 %vm3215_vm0, %v3216_v1  ;;  %v89_v3 = vld [vmem:[#allocation5 + $0x8] sm:$0xff]  ;;  %v90_v4 = vld [vmem:[#allocation5 + $0x10] sm:$0xff]  ;;  %v91_v6 = vld [vmem:[#allocation5 + $0x18] sm:$0xff]  ;;  %vm96_vm1 = vcmask 523264   ;;  %s3217_s4 = smov [#allocation11]  }
  0x5c   :  { %2652 = vmatprep.subr.bf16.mxu1 %v3214_v0  ;;  %2112 = vmatprep.mubr.msk.f32.mxu1 %vm3215_vm0, %v3216_v1  ;;  %v2641_v5 = vpack.c.bf16 %v89_v3, %v88_v2  ;;  %v2644_v7 = vpack.c.bf16 %v91_v6, %v90_v4  ;;  %v92_v8 = vld [vmem:[#allocation5 + $0x20] sm:$0xff]  ;;  %v93_v9 = vld [vmem:[#allocation5 + $0x28] sm:$0xff]  ;;  %v94_v11 = vld [vmem:[#allocation5 + $0x30] sm:$0xff]  ;;  %s1768_s28 = sshll.u32 %s3217_s4, 4  ;;  %s1769_s28 = int_to_ptr.vmem [resolvable:$true] %s1768_s28 }
  0x5d   :  { %v2647_v10 = vpack.c.bf16 %v93_v9, %v92_v8  ;;  %v95_v12 = vld [vmem:[#allocation5 + $0x38] sm:$0xff]  ;;  %v172_v18 = vld [vmem:[#allocation8] sm:$0xff]  ;;  %v174_v20 = vld [vmem:[#allocation8 + $0x10] sm:$0xff]  ;;  %s3175_s29 = scalar_lea.vmem %s1769_s28, 128  ;;  %p3180_p13 = scmp.lt.s32.totalorder %s1769_s28, %s1769_s28 }
  0x5e   :  { %2642 = vmatpush3.bf16.msra.mxu0 %v2641_v5  ;;  %v2650_v13 = vpack.c.bf16 %v95_v12, %v94_v11  ;;  %v87_v14 = vld [vmem:[#allocation2] sm:$0xff]  ;;  %v175_v22 = vld [vmem:[#allocation8 + $0x18] sm:$0xff]  ;;  %v176_v24 = vld [vmem:[#allocation8 + $0x20] sm:$0xff]  ;;  %p3176_p12 = scmp.ne.s32.totalorder %s1769_s28, %s3175_s29  ;;  %p3181_p0 = scmp.lt.s32.totalorder %s3175_s29, %s3175_s29 }
  0x5f   :  { %2643 = vmatprep.subr.bf16.mxu0 %v3214_v0  ;;  %v173_v19 = vld [vmem:[#allocation8 + $0x8] sm:$0xff]  ;;  %v2656_v23 = vpack.c.bf16 %v175_v22, %v174_v20  ;;  %v178_v31 = vld [vmem:[#allocation8 + $0x30] sm:$0xff]  ;;  %v179_v32 = vld [vmem:[#allocation8 + $0x38] sm:$0xff] }
  0x60   :  { %v2653_v21 = vpack.c.bf16 %v173_v19, %v172_v18  ;;  %v177_v25 = vld [vmem:[#allocation8 + $0x28] sm:$0xff]  ;;  %v2662_v33 = vpack.c.bf16 %v179_v32, %v178_v31  ;;  %v180_v34 = vld [vmem:[#allocation8 + $0x40] sm:$0xff]  ;;  %v182_v37 = vld [vmem:[#allocation8 + $0x50] sm:$0xff]  ;;  %p3182_p1 = por %p3181_p0, %p3180_p13 }
  0x61   :  { %v2659_v26 = vpack.c.bf16 %v177_v25, %v176_v24  ;;  %v181_v35 = vld [vmem:[#allocation8 + $0x48] sm:$0xff]  ;;  %v183_v38 = vld [vmem:[#allocation8 + $0x58] sm:$0xff]  ;;  %v184_v40 = vld [vmem:[#allocation8 + $0x60] sm:$0xff] }
  0x62   :  { %2645 = vmatpush3.bf16.msra.mxu0 %v2644_v7  ;;  %2654 = vmatpush3.bf16.msra.mxu1 %v2653_v21  ;;  %v2665_v36 = vpack.c.bf16 %v181_v35, %v180_v34  ;;  %v2668_v39 = vpack.c.bf16 %v183_v38, %v182_v37  ;;  %v185_v41 = vld [vmem:[#allocation8 + $0x68] sm:$0xff]  ;;  %v186_v43 = vld [vmem:[#allocation8 + $0x70] sm:$0xff]  ;;  %v187_v44 = vld [vmem:[#allocation8 + $0x78] sm:$0xff]  ;;  %v216_v7 = vlaneseq  ;;  %p3183_p2 = pnand %p3182_p1, %p3176_p12 }
  0x63   :  { %2646 = vmatprep.subr.bf16.mxu0 %v3214_v0  ;;  %2655 = vmatprep.subr.bf16.mxu1 %v3214_v0  ;;  %v2671_v42 = vpack.c.bf16 %v185_v41, %v184_v40  ;;  %v2674_v45 = vpack.c.bf16 %v187_v44, %v186_v43  ;;  %v188_v46 = vld [vmem:[#allocation10] sm:$0xff]  ;;  %v189_v47 = vld [vmem:[#allocation10 + $0x8] sm:$0xff]  ;;  %v190_v48 = vld [vmem:[#allocation10 + $0x10] sm:$0xff] }
  0x64   :  { %v2677_v49 = vpack.c.bf16 %v189_v47, %v188_v46  ;;  %v191_v50 = vld [vmem:[#allocation10 + $0x18] sm:$0xff]  ;;  %v192_v52 = vld [vmem:[#allocation10 + $0x20] sm:$0xff]  ;;  %v193_v53 = vld [vmem:[#allocation10 + $0x28] sm:$0xff]  ;;  %v217_v9 = vshrl.u32 %v216_v7, 7 }
  0x65   :  { %v2680_v51 = vpack.c.bf16 %v191_v50, %v190_v48  ;;  %v2683_v54 = vpack.c.bf16 %v193_v53, %v192_v52  ;;  %v194_v55 = vld [vmem:[#allocation10 + $0x30] sm:$0xff]  ;;  %v195_v56 = vld [vmem:[#allocation10 + $0x38] sm:$0xff]  ;;  %v196_v58 = vld [vmem:[#allocation10 + $0x40] sm:$0xff] }
  0x66   :  { %2648 = vmatpush3.bf16.msra.mxu0 %v2647_v10  ;;  %2657 = vmatpush3.bf16.msra.mxu1 %v2656_v23  ;;  %v2686_v57 = vpack.c.bf16 %v195_v56, %v194_v55  ;;  %v197_v59 = vld [vmem:[#allocation10 + $0x48] sm:$0xff]  ;;  %v198_v61 = vld [vmem:[#allocation10 + $0x50] sm:$0xff]  ;;  %v199_v62 = vld [vmem:[#allocation10 + $0x58] sm:$0xff]  ;;  %v3352_v10 = vsub.s32 0, %v217_v9  ;;  %v3354_v12 = vsub.s32 1, %v217_v9 }
  0x67   :  { %2649 = vmatprep.subr.bf16.mxu0 %v3214_v0  ;;  %2658 = vmatprep.subr.bf16.mxu1 %v3214_v0  ;;  %v2689_v60 = vpack.c.bf16 %v197_v59, %v196_v58  ;;  %v2692_v63 = vpack.c.bf16 %v199_v62, %v198_v61  ;;  %v200_v2 = vld [vmem:[#allocation10 + $0x60] sm:$0xff]  ;;  %v201_v3 = vld [vmem:[#allocation10 + $0x68] sm:$0xff]  ;;  %v171_v11 = vld [vmem:[#allocation7] sm:$0x3] }
  0x68   :  { %v2695_v4 = vpack.c.bf16 %v201_v3, %v200_v2  ;;  %v202_v20 = vld [vmem:[#allocation10 + $0x70] sm:$0xff]  ;;  %v203_v21 = vld [vmem:[#allocation10 + $0x78] sm:$0xff]  ;;  %v372_v31 = vld [vmem:[#allocation8 + $0x88] sm:$0xff] }
  0x69   :  { %v2698_v22 = vpack.c.bf16 %v203_v21, %v202_v20  ;;  %v373_v32 = vld [vmem:[#allocation8 + $0x90] sm:$0xff]  ;;  %v374_v34 = vld [vmem:[#allocation8 + $0x98] sm:$0xff]  ;;  %v376_v37 = vld [vmem:[#allocation8 + $0xa8] sm:$0xff] }
  0x6a   :  { %2651 = vmatpush3.bf16.msra.mxu0 %v2650_v13  ;;  %2660 = vmatpush3.bf16.msra.mxu1 %v2659_v26  ;;  %v219_v13 = vrot.slane %v171_v11, %v3352_v10  ;;  %v2704_v35 = vpack.c.bf16 %v374_v34, %v373_v32  ;;  %v378_v43 = vld [vmem:[#allocation8 + $0xb8] sm:$0xff]  ;;  %v380_v46 = vld [vmem:[#allocation8 + $0xc8] sm:$0xff]  ;;  %v381_v48 = vld [vmem:[#allocation8 + $0xd0] sm:$0xff] }
  0x6b   :  { %2676 = vmatprep.subr.bf16.mxu0 %v3214_v0  ;;  %2661 = vmatprep.subr.bf16.mxu1 %v3214_v0  ;;  %v384_v52 = vld [vmem:[#allocation8 + $0xe8] sm:$0xff]  ;;  %v386_v55 = vld [vmem:[#allocation8 + $0xf8] sm:$0xff]  ;;  %v390_v59 = vld [vmem:[#allocation10 + $0x90] sm:$0xff] }
  0x6c   :  { %v389_v58 = vld [vmem:[#allocation10 + $0x88] sm:$0xff]  ;;  %v391_v61 = vld [vmem:[#allocation10 + $0x98] sm:$0xff]  ;;  %v396_v7 = vld [vmem:[#allocation10 + $0xc0] sm:$0xff] }
  0x6d   :  { %2078 = vmatmul.mubr.msk.f32.vlgmr.msra.gmra.mrb[0].mxu0 %vm96_vm1, %v87_v14  ;;  %v2728_v62 = vpack.c.bf16 %v391_v61, %v390_v59  ;;  %v393_v2 = vld [vmem:[#allocation10 + $0xa8] sm:$0xff] }
  0x6e   :  { %2147 = vmatprep.mubr.msk.f32.mxu0 %vm3215_vm0, %v3216_v1  ;;  %2663 = vmatpush3.bf16.msra.mxu1 %v2662_v33  ;;  %v583_v61 = vld [vmem:[#allocation8 + $0x168] sm:$0xff] }
  0x6f   :  { %2664 = vmatprep.subr.bf16.mxu1 %v3214_v0  ;;  %2678 = vmatpush3.bf16.msra.mxu0 %v2677_v49  ;;  %v382_v49 = vld [vmem:[#allocation8 + $0xd8] sm:$0xff] }
  0x70   :  { %2679 = vmatprep.subr.bf16.mxu0 %v3214_v0  ;;  %v2716_v50 = vpack.c.bf16 %v382_v49, %v381_v48 }
  0x72   :  { %2666 = vmatpush3.bf16.msra.mxu1 %v2665_v36  ;;  %v375_v36 = vld [vmem:[#allocation8 + $0xa0] sm:$0xff] }
  0x73   :  { %2667 = vmatprep.subr.bf16.mxu1 %v3214_v0  ;;  %2681 = vmatpush3.bf16.msra.mxu0 %v2680_v51  ;;  %v2707_v38 = vpack.c.bf16 %v376_v37, %v375_v36  ;;  %v383_v51 = vld [vmem:[#allocation8 + $0xe0] sm:$0xff] }
  0x74   :  { %2682 = vmatprep.subr.bf16.mxu0 %v3214_v0  ;;  %v2719_v53 = vpack.c.bf16 %v384_v52, %v383_v51  ;;  %v576_v51 = vld [vmem:[#allocation8 + $0x130] sm:$0xff]  ;;  %v577_v52 = vld [vmem:[#allocation8 + $0x138] sm:$0xff] }
  0x76   :  { %2669 = vmatpush3.bf16.msra.mxu1 %v2668_v39 }
  0x77   :  { %2670 = vmatprep.subr.bf16.mxu1 %v3214_v0  ;;  %2684 = vmatpush3.bf16.msra.mxu0 %v2683_v54  ;;  %v385_v54 = vld [vmem:[#allocation8 + $0xf0] sm:$0xff] }
  0x78   :  { %2685 = vmatprep.subr.bf16.mxu0 %v3214_v0  ;;  %v2722_v56 = vpack.c.bf16 %v386_v55, %v385_v54  ;;  %v578_v54 = vld [vmem:[#allocation8 + $0x140] sm:$0xff]  ;;  %v579_v55 = vld [vmem:[#allocation8 + $0x148] sm:$0xff] }
  0x7a   :  { %2672 = vmatpush3.bf16.msra.mxu1 %v2671_v42  ;;  %v377_v42 = vld [vmem:[#allocation8 + $0xb0] sm:$0xff] }
  0x7b   :  { %2673 = vmatprep.subr.bf16.mxu1 %v3214_v0  ;;  %2687 = vmatpush3.bf16.msra.mxu0 %v2686_v57  ;;  %v2710_v44 = vpack.c.bf16 %v378_v43, %v377_v42  ;;  %v388_v57 = vld [vmem:[#allocation10 + $0x80] sm:$0xff]  ;;  %v573_v43 = vld [vmem:[#allocation8 + $0x118] sm:$0xff] }
  0x7c   :  { %2688 = vmatprep.subr.bf16.mxu0 %v3214_v0 }
  0x7e   :  { %2675 = vmatpush3.bf16.msra.mxu1 %v2674_v45  ;;  %v379_v45 = vld [vmem:[#allocation8 + $0xc0] sm:$0xff] }
  0x7f   :  { %2700 = vmatprep.subr.bf16.mxu1 %v3214_v0  ;;  %2690 = vmatpush3.bf16.msra.mxu0 %v2689_v60  ;;  %v2713_v47 = vpack.c.bf16 %v380_v46, %v379_v45  ;;  %v2725_v60 = vpack.c.bf16 %v389_v58, %v388_v57  ;;  %v574_v45 = vld [vmem:[#allocation8 + $0x120] sm:$0xff]  ;;  %v575_v46 = vld [vmem:[#allocation8 + $0x128] sm:$0xff]  ;;  %v580_v57 = vld [vmem:[#allocation8 + $0x150] sm:$0xff] }
  0x80   :  { %2691 = vmatprep.subr.bf16.mxu0 %v3214_v0  ;;  %v581_v58 = vld [vmem:[#allocation8 + $0x158] sm:$0xff] }
  0x81   :  { %v2764_v59 = vpack.c.bf16 %v581_v58, %v580_v57 }
  0x83   :  { %2693 = vmatpush3.bf16.msra.mxu0 %v2692_v63  ;;  %v392_v63 = vld [vmem:[#allocation10 + $0xa0] sm:$0xff] }
  0x84   :  { %2694 = vmatprep.subr.bf16.mxu0 %v3214_v0  ;;  %v2731_v3 = vpack.c.bf16 %v393_v2, %v392_v63  ;;  %v584_v63 = vld [vmem:[#allocation8 + $0x170] sm:$0xff]  ;;  %v585_v2 = vld [vmem:[#allocation8 + $0x178] sm:$0xff] }
  0x87   :  { %2696 = vmatpush3.bf16.msra.mxu0 %v2695_v4  ;;  %v394_v4 = vld [vmem:[#allocation10 + $0xb0] sm:$0xff] }
  0x88   :  { %2697 = vmatprep.subr.bf16.mxu0 %v3214_v0 }
  0x8b   :  { %2699 = vmatpush3.bf16.msra.mxu0 %v2698_v22  ;;  %v369_v22 = vld [vmem:[#allocation7 + $0x2] sm:$0x3] }
  0x8c   :  { %2724 = vmatprep.subr.bf16.mxu0 %v3214_v0 }
 0x140   :  { %v166_v15 = vpop.f32.mrb[0].mxu0 }
 0x141   :  { %v3329_v16 = vmax.f32 %v166_v15, 0.0  ;;  %v2079_v17 = vpop.f32.mrb[1].mxu0 }
 0x142   :  { %v224_v17 = vrot.slane %v171_v11, %v3354_v12  ;;  %v398_v11 = vld [vmem:[#allocation10 + $0xd0] sm:$0xff] }
 0x143   :  { %204 = vadd.xlane.f32.xlu0 %v3329_v16 }
 0x1d0   :  { %v205_v27 = vpop.xlane.xlu0 %204 }
 0x1d1   :  { %v207_v28 = vmul.f32 0.0078125, %v205_v27 }
 0x1d3   :  { %v3336_v29 = vsub.f32 %v3329_v16, %v207_v28 }
 0x1d5   :  { %v209_v30 = vmul.f32 %v3336_v29, %v3336_v29 }
 0x1d7   :  { %210 = vadd.xlane.f32.xlu0 %v209_v30  ;;  %v371_v30 = vld [vmem:[#allocation8 + $0x80] sm:$0xff] }
 0x1d8   :  { %v2701_v33 = vpack.c.bf16 %v372_v31, %v371_v30  ;;  %v402_v30 = vld [vmem:[#allocation10 + $0xf0] sm:$0xff]  ;;  %v403_v31 = vld [vmem:[#allocation10 + $0xf8] sm:$0xff] }
 0x1d9   :  { %v2746_v32 = vpack.c.bf16 %v403_v31, %v402_v30 }
 0x264   :  { %v211_v5 = vpop.xlane.xlu0 %210 }
 0x265   :  { %v212_v6 = vmul.f32 0.0078125, %v211_v5  ;;  %v395_v5 = vld [vmem:[#allocation10 + $0xb8] sm:$0xff] }
 0x267   :  { %v213_v8 = vadd.f32 1e-05, %v212_v6  ;;  %v2734_v6 = vpack.c.bf16 %v395_v5, %v394_v4  ;;  %v587_v4 = vld [vmem:[#allocation10 + $0x100] sm:$0xff]  ;;  %v588_v5 = vld [vmem:[#allocation10 + $0x108] sm:$0xff] }
 0x269   :  { %3049 = vrsqrt.f32 %v213_v8  ;;  %v397_v8 = vld [vmem:[#allocation10 + $0xc8] sm:$0xff] }
 0x26a   :  { %v2737_v9 = vpack.c.bf16 %v397_v8, %v396_v7  ;;  %v2773_v7 = vpack.c.bf16 %v588_v5, %v587_v4  ;;  %v590_v8 = vld [vmem:[#allocation10 + $0x118] sm:$0xff]  ;;  %v779_v4 = vld [vmem:[#allocation8 + $0x1d0] sm:$0xff] }
 0x26b   :  { %v780_v5 = vld [vmem:[#allocation8 + $0x1d8] sm:$0xff] }
 0x273   :  { %v3050_v14 = vpop.eup %3049 }
 0x274   :  { %v215_v15 = vmul.f32 %v3050_v14, %v3336_v29 }
 0x276   :  { %v220_v18 = vmul.f32 %v219_v13, %v215_v15  ;;  %v399_v13 = vld [vmem:[#allocation10 + $0xd8] sm:$0xff]  ;;  %v400_v15 = vld [vmem:[#allocation10 + $0xe0] sm:$0xff] }
 0x277   :  { %v2740_v14 = vpack.c.bf16 %v399_v13, %v398_v11  ;;  %v591_v11 = vld [vmem:[#allocation10 + $0x120] sm:$0xff]  ;;  %v592_v13 = vld [vmem:[#allocation10 + $0x128] sm:$0xff] }
 0x278   :  { %v225_v19 = vadd.f32 %v224_v17, %v220_v18  ;;  %v401_v17 = vld [vmem:[#allocation10 + $0xe8] sm:$0xff] }
 0x279   :  { %v2743_v18 = vpack.c.bf16 %v401_v17, %v400_v15  ;;  %v593_v15 = vld [vmem:[#allocation10 + $0x130] sm:$0xff]  ;;  %v594_v17 = vld [vmem:[#allocation10 + $0x138] sm:$0xff] }
 0x27a   :  { %2113 = vmatmul.mubr.f32.vlgmr.msra.gmra.mrb[0].mxu1 %v225_v19 }
 0x27b   :  { %2182 = vmatprep.mubr.msk.f32.mxu1 %vm3215_vm0, %v3216_v1  ;;  %2702 = vmatpush3.bf16.msra.mxu1 %v2701_v33 }
 0x27c   :  { %2703 = vmatprep.subr.bf16.mxu1 %v3214_v0 }
 0x27f   :  { %2705 = vmatpush3.bf16.msra.mxu1 %v2704_v35 }
 0x280   :  { %2706 = vmatprep.subr.bf16.mxu1 %v3214_v0 }
 0x283   :  { %2708 = vmatpush3.bf16.msra.mxu1 %v2707_v38 }
 0x284   :  { %2709 = vmatprep.subr.bf16.mxu1 %v3214_v0 }
 0x287   :  { %2711 = vmatpush3.bf16.msra.mxu1 %v2710_v44 }
 0x288   :  { %2712 = vmatprep.subr.bf16.mxu1 %v3214_v0 }
 0x28b   :  { %2714 = vmatpush3.bf16.msra.mxu1 %v2713_v47  ;;  %v2755_v47 = vpack.c.bf16 %v575_v46, %v574_v45 }
 0x28c   :  { %2715 = vmatprep.subr.bf16.mxu1 %v3214_v0 }
 0x28f   :  { %2717 = vmatpush3.bf16.msra.mxu1 %v2716_v50 }
 0x290   :  { %2718 = vmatprep.subr.bf16.mxu1 %v3214_v0 }
 0x293   :  { %2720 = vmatpush3.bf16.msra.mxu1 %v2719_v53  ;;  %v2758_v53 = vpack.c.bf16 %v577_v52, %v576_v51  ;;  %v772_v52 = vld [vmem:[#allocation8 + $0x198] sm:$0xff] }
 0x294   :  { %2721 = vmatprep.subr.bf16.mxu1 %v3214_v0 }
 0x297   :  { %2723 = vmatpush3.bf16.msra.mxu1 %v2722_v56  ;;  %v2761_v56 = vpack.c.bf16 %v579_v55, %v578_v54  ;;  %v773_v54 = vld [vmem:[#allocation8 + $0x1a0] sm:$0xff]  ;;  %v774_v55 = vld [vmem:[#allocation8 + $0x1a8] sm:$0xff] }
 0x298   :  { %2748 = vmatprep.subr.bf16.mxu1 %v3214_v0 }
 0x34d   :  { %v292_v23 = vpop.f32.mrb[0].mxu1 }
 0x34e   :  { %v296_v24 = vmax.f32 %v292_v23, 0.0  ;;  %v2114_v25 = vpop.f32.mrb[1].mxu1  ;;  %v418_v23 = vrot.slane %v369_v22, %v3352_v10 }
 0x350   :  { %2148 = vmatmul.mubr.f32.vlgmr.msra.gmra.mrb[2].mxu0 %v296_v24 }
 0x351   :  { %2217 = vmatprep.mubr.msk.f32.mxu0 %vm3215_vm0, %v3216_v1  ;;  %2726 = vmatpush3.bf16.msra.mxu0 %v2725_v60  ;;  %v582_v60 = vld [vmem:[#allocation8 + $0x160] sm:$0xff] }
 0x352   :  { %2727 = vmatprep.subr.bf16.mxu0 %v3214_v0 }
 0x355   :  { %2729 = vmatpush3.bf16.msra.mxu0 %v2728_v62  ;;  %v2767_v62 = vpack.c.bf16 %v583_v61, %v582_v60  ;;  %v775_v60 = vld [vmem:[#allocation8 + $0x1b0] sm:$0xff]  ;;  %v776_v61 = vld [vmem:[#allocation8 + $0x1b8] sm:$0xff] }
 0x356   :  { %2730 = vmatprep.subr.bf16.mxu0 %v3214_v0 }
 0x359   :  { %2732 = vmatpush3.bf16.msra.mxu0 %v2731_v3  ;;  %v2770_v3 = vpack.c.bf16 %v585_v2, %v584_v63  ;;  %v777_v63 = vld [vmem:[#allocation8 + $0x1c0] sm:$0xff]  ;;  %v778_v2 = vld [vmem:[#allocation8 + $0x1c8] sm:$0xff] }
 0x35a   :  { %2733 = vmatprep.subr.bf16.mxu0 %v3214_v0 }
 0x35d   :  { %2735 = vmatpush3.bf16.msra.mxu0 %v2734_v6  ;;  %v589_v6 = vld [vmem:[#allocation10 + $0x110] sm:$0xff] }
 0x35e   :  { %2736 = vmatprep.subr.bf16.mxu0 %v3214_v0 }
 0x361   :  { %2738 = vmatpush3.bf16.msra.mxu0 %v2737_v9  ;;  %v2776_v9 = vpack.c.bf16 %v590_v8, %v589_v6  ;;  %v2812_v6 = vpack.c.bf16 %v780_v5, %v779_v4  ;;  %v782_v8 = vld [vmem:[#allocation8 + $0x1e8] sm:$0xff] }
 0x362   :  { %2739 = vmatprep.subr.bf16.mxu0 %v3214_v0 }
 0x365   :  { %2741 = vmatpush3.bf16.msra.mxu0 %v2740_v14  ;;  %v2779_v14 = vpack.c.bf16 %v592_v13, %v591_v11  ;;  %v783_v11 = vld [vmem:[#allocation8 + $0x1f0] sm:$0xff]  ;;  %v784_v13 = vld [vmem:[#allocation8 + $0x1f8] sm:$0xff] }
 0x366   :  { %2742 = vmatprep.subr.bf16.mxu0 %v3214_v0 }
 0x369   :  { %2744 = vmatpush3.bf16.msra.mxu0 %v2743_v18  ;;  %v2782_v18 = vpack.c.bf16 %v594_v17, %v593_v15  ;;  %v786_v15 = vld [vmem:[#allocation10 + $0x180] sm:$0xff]  ;;  %v787_v17 = vld [vmem:[#allocation10 + $0x188] sm:$0xff] }
 0x36a   :  { %2745 = vmatprep.subr.bf16.mxu0 %v3214_v0 }
 0x36d   :  { %2747 = vmatpush3.bf16.msra.mxu0 %v2746_v32  ;;  %v568_v32 = vld [vmem:[#allocation7 + $0x4] sm:$0x3] }
 0x36e   :  { %2772 = vmatprep.subr.bf16.mxu0 %v3214_v0 }
 0x423   :  { %v363_v26 = vpop.f32.mrb[2].mxu0 }
 0x424   :  { %v364_v27 = vadd.f32 %v363_v26, %v3329_v16  ;;  %v2149_v28 = vpop.f32.mrb[3].mxu0  ;;  %v423_v26 = vrot.slane %v369_v22, %v3354_v12  ;;  %v597_v22 = vld [vmem:[#allocation10 + $0x150] sm:$0xff] }
 0x426   :  { %v3365_v29 = vmax.f32 %v364_v27, 0.0 }
 0x428   :  { %404 = vadd.xlane.f32.xlu1 %v3365_v29 }
 0x4b5   :  { %v405_v16 = vpop.xlane.xlu1 %404 }
 0x4b6   :  { %v406_v39 = vmul.f32 0.0078125, %v405_v16 }
 0x4b8   :  { %v3372_v40 = vsub.f32 %v3365_v29, %v406_v39  ;;  %v570_v39 = vld [vmem:[#allocation8 + $0x100] sm:$0xff] }
 0x4ba   :  { %v408_v41 = vmul.f32 %v3372_v40, %v3372_v40 }
 0x4bc   :  { %409 = vadd.xlane.f32.xlu1 %v408_v41  ;;  %v572_v41 = vld [vmem:[#allocation8 + $0x110] sm:$0xff] }
 0x4bd   :  { %v2752_v44 = vpack.c.bf16 %v573_v43, %v572_v41 }
 0x549   :  { %v410_v19 = vpop.xlane.xlu1 %409 }
 0x54a   :  { %v411_v20 = vmul.f32 0.0078125, %v410_v19  ;;  %v595_v19 = vld [vmem:[#allocation10 + $0x140] sm:$0xff] }
 0x54c   :  { %v412_v21 = vadd.f32 1e-05, %v411_v20  ;;  %v596_v20 = vld [vmem:[#allocation10 + $0x148] sm:$0xff] }
 0x54e   :  { %3051 = vrsqrt.f32 %v412_v21  ;;  %v2785_v21 = vpack.c.bf16 %v596_v20, %v595_v19  ;;  %v2821_v19 = vpack.c.bf16 %v787_v17, %v786_v15  ;;  %v789_v20 = vld [vmem:[#allocation10 + $0x198] sm:$0xff]  ;;  %v978_v15 = vld [vmem:[#allocation8 + $0x250] sm:$0xff] }
 0x54f   :  { %v979_v17 = vld [vmem:[#allocation8 + $0x258] sm:$0xff] }
 0x558   :  { %v3052_v24 = vpop.eup %3051 }
 0x559   :  { %v414_v25 = vmul.f32 %v3052_v24, %v3372_v40  ;;  %v571_v40 = vld [vmem:[#allocation8 + $0x108] sm:$0xff] }
 0x55a   :  { %v2749_v42 = vpack.c.bf16 %v571_v40, %v570_v39  ;;  %v601_v39 = vld [vmem:[#allocation10 + $0x170] sm:$0xff]  ;;  %v602_v40 = vld [vmem:[#allocation10 + $0x178] sm:$0xff] }
 0x55b   :  { %v419_v27 = vmul.f32 %v418_v23, %v414_v25  ;;  %v598_v23 = vld [vmem:[#allocation10 + $0x158] sm:$0xff]  ;;  %v599_v25 = vld [vmem:[#allocation10 + $0x160] sm:$0xff]  ;;  %v2794_v41 = vpack.c.bf16 %v602_v40, %v601_v39 }
 0x55c   :  { %v2788_v24 = vpack.c.bf16 %v598_v23, %v597_v22  ;;  %v790_v22 = vld [vmem:[#allocation10 + $0x1a0] sm:$0xff]  ;;  %v791_v23 = vld [vmem:[#allocation10 + $0x1a8] sm:$0xff] }
 0x55d   :  { %v424_v28 = vadd.f32 %v423_v26, %v419_v27  ;;  %v600_v26 = vld [vmem:[#allocation10 + $0x168] sm:$0xff] }
 0x55e   :  { %v2791_v27 = vpack.c.bf16 %v600_v26, %v599_v25  ;;  %v792_v25 = vld [vmem:[#allocation10 + $0x1b0] sm:$0xff]  ;;  %v793_v26 = vld [vmem:[#allocation10 + $0x1b8] sm:$0xff] }
 0x55f   :  { %2183 = vmatmul.mubr.f32.vlgmr.msra.gmra.mrb[2].mxu1 %v424_v28 }
 0x560   :  { %2252 = vmatprep.mubr.msk.f32.mxu1 %vm3215_vm0, %v3216_v1  ;;  %2750 = vmatpush3.bf16.msra.mxu1 %v2749_v42 }
 0x561   :  { %2751 = vmatprep.subr.bf16.mxu1 %v3214_v0 }
 0x564   :  { %2753 = vmatpush3.bf16.msra.mxu1 %v2752_v44 }
 0x565   :  { %2754 = vmatprep.subr.bf16.mxu1 %v3214_v0 }
 0x568   :  { %2756 = vmatpush3.bf16.msra.mxu1 %v2755_v47 }
 0x569   :  { %2757 = vmatprep.subr.bf16.mxu1 %v3214_v0 }
 0x56c   :  { %2759 = vmatpush3.bf16.msra.mxu1 %v2758_v53 }
 0x56d   :  { %2760 = vmatprep.subr.bf16.mxu1 %v3214_v0 }
 0x570   :  { %2762 = vmatpush3.bf16.msra.mxu1 %v2761_v56  ;;  %v2803_v56 = vpack.c.bf16 %v774_v55, %v773_v54 }
 0x571   :  { %2763 = vmatprep.subr.bf16.mxu1 %v3214_v0 }
 0x574   :  { %2765 = vmatpush3.bf16.msra.mxu1 %v2764_v59 }
 0x575   :  { %2766 = vmatprep.subr.bf16.mxu1 %v3214_v0 }
 0x578   :  { %2768 = vmatpush3.bf16.msra.mxu1 %v2767_v62  ;;  %v2806_v62 = vpack.c.bf16 %v776_v61, %v775_v60  ;;  %v971_v61 = vld [vmem:[#allocation8 + $0x218] sm:$0xff] }
 0x579   :  { %2769 = vmatprep.subr.bf16.mxu1 %v3214_v0 }
 0x57c   :  { %2771 = vmatpush3.bf16.msra.mxu1 %v2770_v3  ;;  %v2809_v3 = vpack.c.bf16 %v778_v2, %v777_v63  ;;  %v972_v63 = vld [vmem:[#allocation8 + $0x220] sm:$0xff]  ;;  %v973_v2 = vld [vmem:[#allocation8 + $0x228] sm:$0xff] }
 0x57d   :  { %2796 = vmatprep.subr.bf16.mxu1 %v3214_v0 }
 0x632   :  { %v491_v33 = vpop.f32.mrb[2].mxu1 }
 0x633   :  { %v495_v34 = vmax.f32 %v491_v33, 0.0  ;;  %v2184_v35 = vpop.f32.mrb[3].mxu1  ;;  %v617_v33 = vrot.slane %v568_v32, %v3352_v10 }
 0x635   :  { %2218 = vmatmul.mubr.f32.vlgmr.msra.gmra.mrb[4].mxu0 %v495_v34 }
 0x636   :  { %2287 = vmatprep.mubr.msk.f32.mxu0 %vm3215_vm0, %v3216_v1  ;;  %2774 = vmatpush3.bf16.msra.mxu0 %v2773_v7  ;;  %v781_v7 = vld [vmem:[#allocation8 + $0x1e0] sm:$0xff] }
 0x637   :  { %2775 = vmatprep.subr.bf16.mxu0 %v3214_v0 }
 0x63a   :  { %2777 = vmatpush3.bf16.msra.mxu0 %v2776_v9  ;;  %v2815_v9 = vpack.c.bf16 %v782_v8, %v781_v7  ;;  %v974_v7 = vld [vmem:[#allocation8 + $0x230] sm:$0xff]  ;;  %v975_v8 = vld [vmem:[#allocation8 + $0x238] sm:$0xff] }
 0x63b   :  { %2778 = vmatprep.subr.bf16.mxu0 %v3214_v0 }
 0x63e   :  { %2780 = vmatpush3.bf16.msra.mxu0 %v2779_v14  ;;  %v2818_v14 = vpack.c.bf16 %v784_v13, %v783_v11  ;;  %v976_v11 = vld [vmem:[#allocation8 + $0x240] sm:$0xff]  ;;  %v977_v13 = vld [vmem:[#allocation8 + $0x248] sm:$0xff] }
 0x63f   :  { %2781 = vmatprep.subr.bf16.mxu0 %v3214_v0 }
 0x642   :  { %2783 = vmatpush3.bf16.msra.mxu0 %v2782_v18  ;;  %v788_v18 = vld [vmem:[#allocation10 + $0x190] sm:$0xff] }
 0x643   :  { %2784 = vmatprep.subr.bf16.mxu0 %v3214_v0 }
 0x646   :  { %2786 = vmatpush3.bf16.msra.mxu0 %v2785_v21  ;;  %v2824_v21 = vpack.c.bf16 %v789_v20, %v788_v18  ;;  %v2860_v18 = vpack.c.bf16 %v979_v17, %v978_v15  ;;  %v981_v20 = vld [vmem:[#allocation8 + $0x268] sm:$0xff] }
 0x647   :  { %2787 = vmatprep.subr.bf16.mxu0 %v3214_v0 }
 0x64a   :  { %2789 = vmatpush3.bf16.msra.mxu0 %v2788_v24  ;;  %v2827_v24 = vpack.c.bf16 %v791_v23, %v790_v22  ;;  %v982_v22 = vld [vmem:[#allocation8 + $0x270] sm:$0xff]  ;;  %v983_v23 = vld [vmem:[#allocation8 + $0x278] sm:$0xff] }
 0x64b   :  { %2790 = vmatprep.subr.bf16.mxu0 %v3214_v0 }
 0x64e   :  { %2792 = vmatpush3.bf16.msra.mxu0 %v2791_v27  ;;  %v2830_v27 = vpack.c.bf16 %v793_v26, %v792_v25  ;;  %v985_v25 = vld [vmem:[#allocation10 + $0x200] sm:$0xff]  ;;  %v986_v26 = vld [vmem:[#allocation10 + $0x208] sm:$0xff] }
 0x64f   :  { %2793 = vmatprep.subr.bf16.mxu0 %v3214_v0 }
 0x652   :  { %2795 = vmatpush3.bf16.msra.mxu0 %v2794_v41  ;;  %v767_v41 = vld [vmem:[#allocation7 + $0x6] sm:$0x3] }
 0x653   :  { %2820 = vmatprep.subr.bf16.mxu0 %v3214_v0 }
 0x708   :  { %v562_v36 = vpop.f32.mrb[4].mxu0 }
 0x709   :  { %v563_v37 = vadd.f32 %v562_v36, %v3365_v29  ;;  %v2219_v38 = vpop.f32.mrb[5].mxu0  ;;  %v622_v36 = vrot.slane %v568_v32, %v3354_v12  ;;  %v796_v32 = vld [vmem:[#allocation10 + $0x1d0] sm:$0xff] }
 0x70b   :  { %v3397_v16 = vmax.f32 %v563_v37, 0.0 }
 0x70d   :  { %603 = vadd.xlane.f32.xlu0 %v3397_v16 }
 0x79a   :  { %v604_v29 = vpop.xlane.xlu0 %603 }
 0x79b   :  { %v605_v48 = vmul.f32 0.0078125, %v604_v29 }
 0x79d   :  { %v3404_v49 = vsub.f32 %v3397_v16, %v605_v48  ;;  %v769_v48 = vld [vmem:[#allocation8 + $0x180] sm:$0xff] }
 0x79f   :  { %v607_v50 = vmul.f32 %v3404_v49, %v3404_v49 }
 0x7a1   :  { %608 = vadd.xlane.f32.xlu1 %v607_v50  ;;  %v771_v50 = vld [vmem:[#allocation8 + $0x190] sm:$0xff] }
 0x7a2   :  { %v2800_v53 = vpack.c.bf16 %v772_v52, %v771_v50 }
 0x82e   :  { %v609_v28 = vpop.xlane.xlu1 %608 }
 0x82f   :  { %v610_v30 = vmul.f32 0.0078125, %v609_v28  ;;  %v794_v28 = vld [vmem:[#allocation10 + $0x1c0] sm:$0xff] }
 0x831   :  { %v611_v31 = vadd.f32 1e-05, %v610_v30  ;;  %v795_v30 = vld [vmem:[#allocation10 + $0x1c8] sm:$0xff] }
 0x833   :  { %3053 = vrsqrt.f32 %v611_v31  ;;  %v2833_v31 = vpack.c.bf16 %v795_v30, %v794_v28  ;;  %v2869_v28 = vpack.c.bf16 %v986_v26, %v985_v25  ;;  %v988_v30 = vld [vmem:[#allocation10 + $0x218] sm:$0xff]  ;;  %v1177_v25 = vld [vmem:[#allocation8 + $0x2d0] sm:$0xff] }
 0x834   :  { %v1178_v26 = vld [vmem:[#allocation8 + $0x2d8] sm:$0xff] }
 0x83d   :  { %v3054_v34 = vpop.eup %3053 }
 0x83e   :  { %v613_v35 = vmul.f32 %v3054_v34, %v3404_v49  ;;  %v770_v49 = vld [vmem:[#allocation8 + $0x188] sm:$0xff] }
 0x83f   :  { %v2797_v51 = vpack.c.bf16 %v770_v49, %v769_v48  ;;  %v800_v48 = vld [vmem:[#allocation10 + $0x1f0] sm:$0xff]  ;;  %v801_v49 = vld [vmem:[#allocation10 + $0x1f8] sm:$0xff] }
 0x840   :  { %v618_v37 = vmul.f32 %v617_v33, %v613_v35  ;;  %v797_v33 = vld [vmem:[#allocation10 + $0x1d8] sm:$0xff]  ;;  %v798_v35 = vld [vmem:[#allocation10 + $0x1e0] sm:$0xff]  ;;  %v2842_v50 = vpack.c.bf16 %v801_v49, %v800_v48 }
 0x841   :  { %v2836_v34 = vpack.c.bf16 %v797_v33, %v796_v32  ;;  %v989_v32 = vld [vmem:[#allocation10 + $0x220] sm:$0xff]  ;;  %v990_v33 = vld [vmem:[#allocation10 + $0x228] sm:$0xff] }
 0x842   :  { %v623_v38 = vadd.f32 %v622_v36, %v618_v37  ;;  %v799_v36 = vld [vmem:[#allocation10 + $0x1e8] sm:$0xff] }
 0x843   :  { %v2839_v37 = vpack.c.bf16 %v799_v36, %v798_v35  ;;  %v991_v35 = vld [vmem:[#allocation10 + $0x230] sm:$0xff]  ;;  %v992_v36 = vld [vmem:[#allocation10 + $0x238] sm:$0xff] }
 0x844   :  { %2253 = vmatmul.mubr.f32.vlgmr.msra.gmra.mrb[4].mxu1 %v623_v38 }
 0x845   :  { %2322 = vmatprep.mubr.msk.f32.mxu1 %vm3215_vm0, %v3216_v1  ;;  %2798 = vmatpush3.bf16.msra.mxu1 %v2797_v51 }
 0x846   :  { %2799 = vmatprep.subr.bf16.mxu1 %v3214_v0 }
 0x849   :  { %2801 = vmatpush3.bf16.msra.mxu1 %v2800_v53 }
 0x84a   :  { %2802 = vmatprep.subr.bf16.mxu1 %v3214_v0 }
 0x84d   :  { %2804 = vmatpush3.bf16.msra.mxu1 %v2803_v56 }
 0x84e   :  { %2805 = vmatprep.subr.bf16.mxu1 %v3214_v0 }
 0x851   :  { %2807 = vmatpush3.bf16.msra.mxu1 %v2806_v62 }
 0x852   :  { %2808 = vmatprep.subr.bf16.mxu1 %v3214_v0 }
 0x855   :  { %2810 = vmatpush3.bf16.msra.mxu1 %v2809_v3  ;;  %v2851_v3 = vpack.c.bf16 %v973_v2, %v972_v63 }
 0x856   :  { %2811 = vmatprep.subr.bf16.mxu1 %v3214_v0 }
 0x859   :  { %2813 = vmatpush3.bf16.msra.mxu1 %v2812_v6 }
 0x85a   :  { %2814 = vmatprep.subr.bf16.mxu1 %v3214_v0 }
 0x85d   :  { %2816 = vmatpush3.bf16.msra.mxu1 %v2815_v9  ;;  %v2854_v9 = vpack.c.bf16 %v975_v8, %v974_v7  ;;  %v1170_v8 = vld [vmem:[#allocation8 + $0x298] sm:$0xff] }
 0x85e   :  { %2817 = vmatprep.subr.bf16.mxu1 %v3214_v0 }
 0x861   :  { %2819 = vmatpush3.bf16.msra.mxu1 %v2818_v14  ;;  %v2857_v14 = vpack.c.bf16 %v977_v13, %v976_v11  ;;  %v1171_v11 = vld [vmem:[#allocation8 + $0x2a0] sm:$0xff]  ;;  %v1172_v13 = vld [vmem:[#allocation8 + $0x2a8] sm:$0xff] }
 0x862   :  { %2844 = vmatprep.subr.bf16.mxu1 %v3214_v0 }
 0x917   :  { %v690_v42 = vpop.f32.mrb[4].mxu1 }
 0x918   :  { %v694_v43 = vmax.f32 %v690_v42, 0.0  ;;  %v2254_v44 = vpop.f32.mrb[5].mxu1  ;;  %v816_v42 = vrot.slane %v767_v41, %v3352_v10 }
 0x91a   :  { %2288 = vmatmul.mubr.f32.vlgmr.msra.gmra.mrb[6].mxu0 %v694_v43 }
 0x91b   :  { %2357 = vmatprep.mubr.msk.f32.mxu0 %vm3215_vm0, %v3216_v1  ;;  %2822 = vmatpush3.bf16.msra.mxu0 %v2821_v19  ;;  %v980_v19 = vld [vmem:[#allocation8 + $0x260] sm:$0xff] }
 0x91c   :  { %2823 = vmatprep.subr.bf16.mxu0 %v3214_v0 }
 0x91f   :  { %2825 = vmatpush3.bf16.msra.mxu0 %v2824_v21  ;;  %v2863_v21 = vpack.c.bf16 %v981_v20, %v980_v19  ;;  %v1173_v19 = vld [vmem:[#allocation8 + $0x2b0] sm:$0xff]  ;;  %v1174_v20 = vld [vmem:[#allocation8 + $0x2b8] sm:$0xff] }
 0x920   :  { %2826 = vmatprep.subr.bf16.mxu0 %v3214_v0 }
 0x923   :  { %2828 = vmatpush3.bf16.msra.mxu0 %v2827_v24  ;;  %v2866_v24 = vpack.c.bf16 %v983_v23, %v982_v22  ;;  %v1175_v22 = vld [vmem:[#allocation8 + $0x2c0] sm:$0xff]  ;;  %v1176_v23 = vld [vmem:[#allocation8 + $0x2c8] sm:$0xff] }
 0x924   :  { %2829 = vmatprep.subr.bf16.mxu0 %v3214_v0 }
 0x927   :  { %2831 = vmatpush3.bf16.msra.mxu0 %v2830_v27  ;;  %v987_v27 = vld [vmem:[#allocation10 + $0x210] sm:$0xff] }
 0x928   :  { %2832 = vmatprep.subr.bf16.mxu0 %v3214_v0 }
 0x92b   :  { %2834 = vmatpush3.bf16.msra.mxu0 %v2833_v31  ;;  %v2872_v31 = vpack.c.bf16 %v988_v30, %v987_v27  ;;  %v2908_v27 = vpack.c.bf16 %v1178_v26, %v1177_v25  ;;  %v1180_v30 = vld [vmem:[#allocation8 + $0x2e8] sm:$0xff] }
 0x92c   :  { %2835 = vmatprep.subr.bf16.mxu0 %v3214_v0 }
 0x92f   :  { %2837 = vmatpush3.bf16.msra.mxu0 %v2836_v34  ;;  %v2875_v34 = vpack.c.bf16 %v990_v33, %v989_v32  ;;  %v1181_v32 = vld [vmem:[#allocation8 + $0x2f0] sm:$0xff]  ;;  %v1182_v33 = vld [vmem:[#allocation8 + $0x2f8] sm:$0xff] }
 0x930   :  { %2838 = vmatprep.subr.bf16.mxu0 %v3214_v0 }
 0x933   :  { %2840 = vmatpush3.bf16.msra.mxu0 %v2839_v37  ;;  %v2878_v37 = vpack.c.bf16 %v992_v36, %v991_v35  ;;  %v1184_v35 = vld [vmem:[#allocation10 + $0x280] sm:$0xff]  ;;  %v1185_v36 = vld [vmem:[#allocation10 + $0x288] sm:$0xff] }
 0x934   :  { %2841 = vmatprep.subr.bf16.mxu0 %v3214_v0 }
 0x937   :  { %2843 = vmatpush3.bf16.msra.mxu0 %v2842_v50  ;;  %v966_v50 = vld [vmem:[#allocation7 + $0x8] sm:$0x3] }
 0x938   :  { %2868 = vmatprep.subr.bf16.mxu0 %v3214_v0 }
 0x9ed   :  { %v761_v45 = vpop.f32.mrb[6].mxu0 }
 0x9ee   :  { %v762_v46 = vadd.f32 %v761_v45, %v3397_v16  ;;  %v2289_v47 = vpop.f32.mrb[7].mxu0  ;;  %v821_v45 = vrot.slane %v767_v41, %v3354_v12  ;;  %v995_v41 = vld [vmem:[#allocation10 + $0x250] sm:$0xff] }
 0x9f0   :  { %v3429_v29 = vmax.f32 %v762_v46, 0.0 }
 0x9f2   :  { %802 = vadd.xlane.f32.xlu0 %v3429_v29 }
 0xa7f   :  { %v803_v16 = vpop.xlane.xlu0 %802 }
 0xa80   :  { %v804_v57 = vmul.f32 0.0078125, %v803_v16 }
 0xa82   :  { %v3436_v58 = vsub.f32 %v3429_v29, %v804_v57  ;;  %v968_v57 = vld [vmem:[#allocation8 + $0x200] sm:$0xff] }
 0xa84   :  { %v806_v59 = vmul.f32 %v3436_v58, %v3436_v58 }
 0xa86   :  { %807 = vadd.xlane.f32.xlu1 %v806_v59  ;;  %v970_v59 = vld [vmem:[#allocation8 + $0x210] sm:$0xff] }
 0xa87   :  { %v2848_v62 = vpack.c.bf16 %v971_v61, %v970_v59 }
 0xb13   :  { %v808_v38 = vpop.xlane.xlu1 %807 }
 0xb14   :  { %v809_v39 = vmul.f32 0.0078125, %v808_v38  ;;  %v993_v38 = vld [vmem:[#allocation10 + $0x240] sm:$0xff] }
 0xb16   :  { %v810_v40 = vadd.f32 1e-05, %v809_v39  ;;  %v994_v39 = vld [vmem:[#allocation10 + $0x248] sm:$0xff] }
 0xb18   :  { %3055 = vrsqrt.f32 %v810_v40  ;;  %v2881_v40 = vpack.c.bf16 %v994_v39, %v993_v38  ;;  %v2917_v38 = vpack.c.bf16 %v1185_v36, %v1184_v35  ;;  %v1187_v39 = vld [vmem:[#allocation10 + $0x298] sm:$0xff]  ;;  %v1376_v35 = vld [vmem:[#allocation8 + $0x350] sm:$0xff] }
 0xb19   :  { %v1377_v36 = vld [vmem:[#allocation8 + $0x358] sm:$0xff] }
 0xb22   :  { %v3056_v43 = vpop.eup %3055 }
 0xb23   :  { %v812_v44 = vmul.f32 %v3056_v43, %v3436_v58  ;;  %v969_v58 = vld [vmem:[#allocation8 + $0x208] sm:$0xff] }
 0xb24   :  { %v2845_v60 = vpack.c.bf16 %v969_v58, %v968_v57  ;;  %v999_v57 = vld [vmem:[#allocation10 + $0x270] sm:$0xff]  ;;  %v1000_v58 = vld [vmem:[#allocation10 + $0x278] sm:$0xff] }
 0xb25   :  { %v817_v46 = vmul.f32 %v816_v42, %v812_v44  ;;  %v996_v42 = vld [vmem:[#allocation10 + $0x258] sm:$0xff]  ;;  %v997_v44 = vld [vmem:[#allocation10 + $0x260] sm:$0xff]  ;;  %v2890_v59 = vpack.c.bf16 %v1000_v58, %v999_v57 }
 0xb26   :  { %v2884_v43 = vpack.c.bf16 %v996_v42, %v995_v41  ;;  %v1188_v41 = vld [vmem:[#allocation10 + $0x2a0] sm:$0xff]  ;;  %v1189_v42 = vld [vmem:[#allocation10 + $0x2a8] sm:$0xff] }
 0xb27   :  { %v822_v47 = vadd.f32 %v821_v45, %v817_v46  ;;  %v998_v45 = vld [vmem:[#allocation10 + $0x268] sm:$0xff] }
 0xb28   :  { %v2887_v46 = vpack.c.bf16 %v998_v45, %v997_v44  ;;  %v1190_v44 = vld [vmem:[#allocation10 + $0x2b0] sm:$0xff]  ;;  %v1191_v45 = vld [vmem:[#allocation10 + $0x2b8] sm:$0xff] }
 0xb29   :  { %2323 = vmatmul.mubr.f32.vlgmr.msra.gmra.mrb[6].mxu1 %v822_v47 }
 0xb2a   :  { %2392 = vmatprep.mubr.msk.f32.mxu1 %vm3215_vm0, %v3216_v1  ;;  %2846 = vmatpush3.bf16.msra.mxu1 %v2845_v60 }
 0xb2b   :  { %2847 = vmatprep.subr.bf16.mxu1 %v3214_v0 }
 0xb2e   :  { %2849 = vmatpush3.bf16.msra.mxu1 %v2848_v62 }
 0xb2f   :  { %2850 = vmatprep.subr.bf16.mxu1 %v3214_v0 }
 0xb32   :  { %2852 = vmatpush3.bf16.msra.mxu1 %v2851_v3 }
 0xb33   :  { %2853 = vmatprep.subr.bf16.mxu1 %v3214_v0 }
 0xb36   :  { %2855 = vmatpush3.bf16.msra.mxu1 %v2854_v9 }
 0xb37   :  { %2856 = vmatprep.subr.bf16.mxu1 %v3214_v0 }
 0xb3a   :  { %2858 = vmatpush3.bf16.msra.mxu1 %v2857_v14  ;;  %v2899_v14 = vpack.c.bf16 %v1172_v13, %v1171_v11 }
 0xb3b   :  { %2859 = vmatprep.subr.bf16.mxu1 %v3214_v0 }
 0xb3e   :  { %2861 = vmatpush3.bf16.msra.mxu1 %v2860_v18 }
 0xb3f   :  { %2862 = vmatprep.subr.bf16.mxu1 %v3214_v0 }
 0xb42   :  { %2864 = vmatpush3.bf16.msra.mxu1 %v2863_v21  ;;  %v2902_v21 = vpack.c.bf16 %v1174_v20, %v1173_v19  ;;  %v1369_v20 = vld [vmem:[#allocation8 + $0x318] sm:$0xff] }
 0xb43   :  { %2865 = vmatprep.subr.bf16.mxu1 %v3214_v0 }
 0xb46   :  { %2867 = vmatpush3.bf16.msra.mxu1 %v2866_v24  ;;  %v2905_v24 = vpack.c.bf16 %v1176_v23, %v1175_v22  ;;  %v1370_v22 = vld [vmem:[#allocation8 + $0x320] sm:$0xff]  ;;  %v1371_v23 = vld [vmem:[#allocation8 + $0x328] sm:$0xff] }
 0xb47   :  { %2892 = vmatprep.subr.bf16.mxu1 %v3214_v0 }
 0xbfc   :  { %v889_v51 = vpop.f32.mrb[6].mxu1 }
 0xbfd   :  { %v893_v52 = vmax.f32 %v889_v51, 0.0  ;;  %v2324_v53 = vpop.f32.mrb[7].mxu1  ;;  %v1015_v51 = vrot.slane %v966_v50, %v3352_v10 }
 0xbff   :  { %2358 = vmatmul.mubr.f32.vlgmr.msra.gmra.mrb[8].mxu0 %v893_v52 }
 0xc00   :  { %2427 = vmatprep.mubr.msk.f32.mxu0 %vm3215_vm0, %v3216_v1  ;;  %2870 = vmatpush3.bf16.msra.mxu0 %v2869_v28  ;;  %v1179_v28 = vld [vmem:[#allocation8 + $0x2e0] sm:$0xff] }
 0xc01   :  { %2871 = vmatprep.subr.bf16.mxu0 %v3214_v0 }
 0xc04   :  { %2873 = vmatpush3.bf16.msra.mxu0 %v2872_v31  ;;  %v2911_v31 = vpack.c.bf16 %v1180_v30, %v1179_v28  ;;  %v1372_v28 = vld [vmem:[#allocation8 + $0x330] sm:$0xff]  ;;  %v1373_v30 = vld [vmem:[#allocation8 + $0x338] sm:$0xff] }
 0xc05   :  { %2874 = vmatprep.subr.bf16.mxu0 %v3214_v0 }
 0xc08   :  { %2876 = vmatpush3.bf16.msra.mxu0 %v2875_v34  ;;  %v2914_v34 = vpack.c.bf16 %v1182_v33, %v1181_v32  ;;  %v1374_v32 = vld [vmem:[#allocation8 + $0x340] sm:$0xff]  ;;  %v1375_v33 = vld [vmem:[#allocation8 + $0x348] sm:$0xff] }
 0xc09   :  { %2877 = vmatprep.subr.bf16.mxu0 %v3214_v0 }
 0xc0c   :  { %2879 = vmatpush3.bf16.msra.mxu0 %v2878_v37  ;;  %v1186_v37 = vld [vmem:[#allocation10 + $0x290] sm:$0xff] }
 0xc0d   :  { %2880 = vmatprep.subr.bf16.mxu0 %v3214_v0 }
 0xc10   :  { %2882 = vmatpush3.bf16.msra.mxu0 %v2881_v40  ;;  %v2920_v40 = vpack.c.bf16 %v1187_v39, %v1186_v37  ;;  %v2956_v37 = vpack.c.bf16 %v1377_v36, %v1376_v35  ;;  %v1379_v39 = vld [vmem:[#allocation8 + $0x368] sm:$0xff] }
 0xc11   :  { %2883 = vmatprep.subr.bf16.mxu0 %v3214_v0 }
 0xc14   :  { %2885 = vmatpush3.bf16.msra.mxu0 %v2884_v43  ;;  %v2923_v43 = vpack.c.bf16 %v1189_v42, %v1188_v41  ;;  %v1380_v41 = vld [vmem:[#allocation8 + $0x370] sm:$0xff]  ;;  %v1381_v42 = vld [vmem:[#allocation8 + $0x378] sm:$0xff] }
 0xc15   :  { %2886 = vmatprep.subr.bf16.mxu0 %v3214_v0 }
 0xc18   :  { %2888 = vmatpush3.bf16.msra.mxu0 %v2887_v46  ;;  %v2926_v46 = vpack.c.bf16 %v1191_v45, %v1190_v44  ;;  %v1383_v44 = vld [vmem:[#allocation10 + $0x300] sm:$0xff]  ;;  %v1384_v45 = vld [vmem:[#allocation10 + $0x308] sm:$0xff] }
 0xc19   :  { %2889 = vmatprep.subr.bf16.mxu0 %v3214_v0 }
 0xc1c   :  { %2891 = vmatpush3.bf16.msra.mxu0 %v2890_v59  ;;  %v1165_v59 = vld [vmem:[#allocation7 + $0xa] sm:$0x3] }
 0xc1d   :  { %2916 = vmatprep.subr.bf16.mxu0 %v3214_v0 }
 0xcd2   :  { %v960_v54 = vpop.f32.mrb[8].mxu0 }
 0xcd3   :  { %v961_v55 = vadd.f32 %v960_v54, %v3429_v29  ;;  %v2359_v56 = vpop.f32.mrb[9].mxu0  ;;  %v1020_v54 = vrot.slane %v966_v50, %v3354_v12  ;;  %v1194_v50 = vld [vmem:[#allocation10 + $0x2d0] sm:$0xff] }
 0xcd5   :  { %v3461_v16 = vmax.f32 %v961_v55, 0.0 }
 0xcd7   :  { %1001 = vadd.xlane.f32.xlu0 %v3461_v16 }
 0xd64   :  { %v1002_v29 = vpop.xlane.xlu0 %1001 }
 0xd65   :  { %v1003_v4 = vmul.f32 0.0078125, %v1002_v29 }
 0xd67   :  { %v3468_v5 = vsub.f32 %v3461_v16, %v1003_v4  ;;  %v1167_v4 = vld [vmem:[#allocation8 + $0x280] sm:$0xff] }
 0xd69   :  { %v1005_v6 = vmul.f32 %v3468_v5, %v3468_v5 }
 0xd6b   :  { %1006 = vadd.xlane.f32.xlu1 %v1005_v6  ;;  %v1169_v6 = vld [vmem:[#allocation8 + $0x290] sm:$0xff] }
 0xd6c   :  { %v2896_v9 = vpack.c.bf16 %v1170_v8, %v1169_v6 }
 0xdf8   :  { %v1007_v47 = vpop.xlane.xlu1 %1006 }
 0xdf9   :  { %v1008_v48 = vmul.f32 0.0078125, %v1007_v47  ;;  %v1192_v47 = vld [vmem:[#allocation10 + $0x2c0] sm:$0xff] }
 0xdfb   :  { %v1009_v49 = vadd.f32 1e-05, %v1008_v48  ;;  %v1193_v48 = vld [vmem:[#allocation10 + $0x2c8] sm:$0xff] }
 0xdfd   :  { %3057 = vrsqrt.f32 %v1009_v49  ;;  %v2929_v49 = vpack.c.bf16 %v1193_v48, %v1192_v47  ;;  %v2965_v47 = vpack.c.bf16 %v1384_v45, %v1383_v44  ;;  %v1386_v48 = vld [vmem:[#allocation10 + $0x318] sm:$0xff] }
 0xdfe   :  { %v1576_v44 = vld [vmem:[#allocation8 + $0x3d8] sm:$0xff] }
 0xe07   :  { %v3058_v52 = vpop.eup %3057 }
 0xe08   :  { %v1011_v53 = vmul.f32 %v3058_v52, %v3468_v5  ;;  %v1168_v5 = vld [vmem:[#allocation8 + $0x288] sm:$0xff] }
 0xe09   :  { %v2893_v7 = vpack.c.bf16 %v1168_v5, %v1167_v4  ;;  %v1198_v4 = vld [vmem:[#allocation10 + $0x2f0] sm:$0xff]  ;;  %v1199_v5 = vld [vmem:[#allocation10 + $0x2f8] sm:$0xff] }
 0xe0a   :  { %v1016_v55 = vmul.f32 %v1015_v51, %v1011_v53  ;;  %v1195_v51 = vld [vmem:[#allocation10 + $0x2d8] sm:$0xff]  ;;  %v1196_v53 = vld [vmem:[#allocation10 + $0x2e0] sm:$0xff]  ;;  %v2938_v6 = vpack.c.bf16 %v1199_v5, %v1198_v4 }
 0xe0b   :  { %v2932_v52 = vpack.c.bf16 %v1195_v51, %v1194_v50  ;;  %v1387_v50 = vld [vmem:[#allocation10 + $0x320] sm:$0xff]  ;;  %v1388_v51 = vld [vmem:[#allocation10 + $0x328] sm:$0xff] }
 0xe0c   :  { %v1021_v56 = vadd.f32 %v1020_v54, %v1016_v55  ;;  %v1197_v54 = vld [vmem:[#allocation10 + $0x2e8] sm:$0xff] }
 0xe0d   :  { %v2935_v55 = vpack.c.bf16 %v1197_v54, %v1196_v53  ;;  %v1389_v53 = vld [vmem:[#allocation10 + $0x330] sm:$0xff]  ;;  %v1390_v54 = vld [vmem:[#allocation10 + $0x338] sm:$0xff] }
 0xe0e   :  { %2393 = vmatmul.mubr.f32.vlgmr.msra.gmra.mrb[8].mxu1 %v1021_v56 }
 0xe0f   :  { %2462 = vmatprep.mubr.msk.f32.mxu1 %vm3215_vm0, %v3216_v1  ;;  %2894 = vmatpush3.bf16.msra.mxu1 %v2893_v7 }
 0xe10   :  { %2895 = vmatprep.subr.bf16.mxu1 %v3214_v0 }
 0xe13   :  { %2897 = vmatpush3.bf16.msra.mxu1 %v2896_v9 }
 0xe14   :  { %2898 = vmatprep.subr.bf16.mxu1 %v3214_v0 }
 0xe17   :  { %2900 = vmatpush3.bf16.msra.mxu1 %v2899_v14 }
 0xe18   :  { %2901 = vmatprep.subr.bf16.mxu1 %v3214_v0 }
 0xe1b   :  { %2903 = vmatpush3.bf16.msra.mxu1 %v2902_v21 }
 0xe1c   :  { %2904 = vmatprep.subr.bf16.mxu1 %v3214_v0 }
 0xe1f   :  { %2906 = vmatpush3.bf16.msra.mxu1 %v2905_v24  ;;  %v2947_v24 = vpack.c.bf16 %v1371_v23, %v1370_v22 }
 0xe20   :  { %2907 = vmatprep.subr.bf16.mxu1 %v3214_v0 }
 0xe23   :  { %2909 = vmatpush3.bf16.msra.mxu1 %v2908_v27 }
 0xe24   :  { %2910 = vmatprep.subr.bf16.mxu1 %v3214_v0 }
 0xe27   :  { %2912 = vmatpush3.bf16.msra.mxu1 %v2911_v31  ;;  %v2950_v31 = vpack.c.bf16 %v1373_v30, %v1372_v28  ;;  %v1568_v30 = vld [vmem:[#allocation8 + $0x398] sm:$0xff] }
 0xe28   :  { %2913 = vmatprep.subr.bf16.mxu1 %v3214_v0 }
 0xe2b   :  { %2915 = vmatpush3.bf16.msra.mxu1 %v2914_v34  ;;  %v2953_v34 = vpack.c.bf16 %v1375_v33, %v1374_v32  ;;  %v1569_v32 = vld [vmem:[#allocation8 + $0x3a0] sm:$0xff]  ;;  %v1570_v33 = vld [vmem:[#allocation8 + $0x3a8] sm:$0xff] }
 0xe2c   :  { %2940 = vmatprep.subr.bf16.mxu1 %v3214_v0 }
 0xee1   :  { %v1088_v60 = vpop.f32.mrb[8].mxu1 }
 0xee2   :  { %v1092_v61 = vmax.f32 %v1088_v60, 0.0  ;;  %v2394_v62 = vpop.f32.mrb[9].mxu1  ;;  %v1214_v60 = vrot.slane %v1165_v59, %v3352_v10 }
 0xee4   :  { %2428 = vmatmul.mubr.f32.vlgmr.msra.gmra.mrb[10].mxu0 %v1092_v61 }
 0xee5   :  { %2497 = vmatprep.mubr.msk.f32.mxu0 %vm3215_vm0, %v3216_v1  ;;  %2918 = vmatpush3.bf16.msra.mxu0 %v2917_v38  ;;  %v1378_v38 = vld [vmem:[#allocation8 + $0x360] sm:$0xff] }
 0xee6   :  { %2919 = vmatprep.subr.bf16.mxu0 %v3214_v0 }
 0xee9   :  { %2921 = vmatpush3.bf16.msra.mxu0 %v2920_v40  ;;  %v2959_v40 = vpack.c.bf16 %v1379_v39, %v1378_v38  ;;  %v1572_v38 = vld [vmem:[#allocation8 + $0x3b8] sm:$0xff] }
 0xeea   :  { %2922 = vmatprep.subr.bf16.mxu0 %v3214_v0 }
 0xeed   :  { %2924 = vmatpush3.bf16.msra.mxu0 %v2923_v43  ;;  %v2962_v43 = vpack.c.bf16 %v1381_v42, %v1380_v41  ;;  %v1574_v41 = vld [vmem:[#allocation8 + $0x3c8] sm:$0xff] }
 0xeee   :  { %2925 = vmatprep.subr.bf16.mxu0 %v3214_v0 }
 0xef1   :  { %2927 = vmatpush3.bf16.msra.mxu0 %v2926_v46  ;;  %v1385_v46 = vld [vmem:[#allocation10 + $0x310] sm:$0xff] }
 0xef2   :  { %2928 = vmatprep.subr.bf16.mxu0 %v3214_v0 }
 0xef5   :  { %2930 = vmatpush3.bf16.msra.mxu0 %v2929_v49  ;;  %v2968_v49 = vpack.c.bf16 %v1386_v48, %v1385_v46  ;;  %v1577_v46 = vld [vmem:[#allocation8 + $0x3e0] sm:$0xff] }
 0xef6   :  { %2931 = vmatprep.subr.bf16.mxu0 %v3214_v0 }
 0xef9   :  { %2933 = vmatpush3.bf16.msra.mxu0 %v2932_v52  ;;  %v2971_v52 = vpack.c.bf16 %v1388_v51, %v1387_v50  ;;  %v1580_v50 = vld [vmem:[#allocation8 + $0x3f8] sm:$0xff] }
 0xefa   :  { %2934 = vmatprep.subr.bf16.mxu0 %v3214_v0 }
 0xefd   :  { %2936 = vmatpush3.bf16.msra.mxu0 %v2935_v55  ;;  %v2974_v55 = vpack.c.bf16 %v1390_v54, %v1389_v53  ;;  %v1583_v53 = vld [vmem:[#allocation10 + $0x388] sm:$0xff]  ;;  %v1584_v54 = vld [vmem:[#allocation10 + $0x390] sm:$0xff] }
 0xefe   :  { %2937 = vmatprep.subr.bf16.mxu0 %v3214_v0 }
 0xf01   :  { %2939 = vmatpush3.bf16.msra.mxu0 %v2938_v6  ;;  %v1364_v6 = vld [vmem:[#allocation7 + $0xc] sm:$0x3] }
 0xf02   :  { %2964 = vmatprep.subr.bf16.mxu0 %v3214_v0 }
 0xfb7   :  { %v1159_v63 = vpop.f32.mrb[10].mxu0 }
 0xfb8   :  { %v1160_v2 = vadd.f32 %v1159_v63, %v3461_v16  ;;  %v2429_v3 = vpop.f32.mrb[11].mxu0  ;;  %v1219_v63 = vrot.slane %v1165_v59, %v3354_v12  ;;  %v1393_v59 = vld [vmem:[#allocation10 + $0x350] sm:$0xff] }
 0xfba   :  { %v3493_v29 = vmax.f32 %v1160_v2, 0.0 }
 0xfbc   :  { %1200 = vadd.xlane.f32.xlu0 %v3493_v29 }
0x1049   :  { %v1201_v16 = vpop.xlane.xlu0 %1200 }
0x104a   :  { %v1202_v15 = vmul.f32 0.0078125, %v1201_v16 }
0x104c   :  { %v3500_v17 = vsub.f32 %v3493_v29, %v1202_v15  ;;  %v1366_v15 = vld [vmem:[#allocation8 + $0x300] sm:$0xff] }
0x104e   :  { %v1204_v18 = vmul.f32 %v3500_v17, %v3500_v17 }
0x1050   :  { %1205 = vadd.xlane.f32.xlu1 %v1204_v18  ;;  %v1368_v18 = vld [vmem:[#allocation8 + $0x310] sm:$0xff] }
0x1051   :  { %v2944_v21 = vpack.c.bf16 %v1369_v20, %v1368_v18 }
0x10dd   :  { %v1206_v56 = vpop.xlane.xlu1 %1205 }
0x10de   :  { %v1207_v57 = vmul.f32 0.0078125, %v1206_v56  ;;  %v1391_v56 = vld [vmem:[#allocation10 + $0x340] sm:$0xff] }
0x10e0   :  { %v1208_v58 = vadd.f32 1e-05, %v1207_v57  ;;  %v1392_v57 = vld [vmem:[#allocation10 + $0x348] sm:$0xff] }
0x10e2   :  { %3059 = vrsqrt.f32 %v1208_v58  ;;  %v2977_v58 = vpack.c.bf16 %v1392_v57, %v1391_v56  ;;  %v1585_v56 = vld [vmem:[#allocation10 + $0x398] sm:$0xff] }
0x10e3   :  { %v3016_v57 = vpack.c.bf16 %v1585_v56, %v1584_v54 }
0x10ec   :  { %v3060_v61 = vpop.eup %3059 }
0x10ed   :  { %v1210_v62 = vmul.f32 %v3060_v61, %v3500_v17  ;;  %v1367_v17 = vld [vmem:[#allocation8 + $0x308] sm:$0xff] }
0x10ee   :  { %v2941_v19 = vpack.c.bf16 %v1367_v17, %v1366_v15  ;;  %v1397_v15 = vld [vmem:[#allocation10 + $0x370] sm:$0xff]  ;;  %v1398_v17 = vld [vmem:[#allocation10 + $0x378] sm:$0xff] }
0x10ef   :  { %v1215_v2 = vmul.f32 %v1214_v60, %v1210_v62  ;;  %v1394_v60 = vld [vmem:[#allocation10 + $0x358] sm:$0xff]  ;;  %v1395_v62 = vld [vmem:[#allocation10 + $0x360] sm:$0xff]  ;;  %v2986_v18 = vpack.c.bf16 %v1398_v17, %v1397_v15 }
0x10f0   :  { %v2980_v61 = vpack.c.bf16 %v1394_v60, %v1393_v59  ;;  %v1587_v59 = vld [vmem:[#allocation10 + $0x3a8] sm:$0xff]  ;;  %v1563_v17 = vld [vmem:[#allocation7 + $0xe] sm:$0x3] }
0x10f1   :  { %v1220_v3 = vadd.f32 %v1219_v63, %v1215_v2  ;;  %v1396_v63 = vld [vmem:[#allocation10 + $0x368] sm:$0xff] }
0x10f2   :  { %v2983_v2 = vpack.c.bf16 %v1396_v63, %v1395_v62  ;;  %v1589_v62 = vld [vmem:[#allocation10 + $0x3b8] sm:$0xff] }
0x10f3   :  { %2463 = vmatmul.mubr.f32.vlgmr.msra.gmra.mrb[10].mxu1 %v1220_v3 }
0x10f4   :  { %2532 = vmatprep.mubr.msk.f32.mxu1 %vm3215_vm0, %v3216_v1  ;;  %2942 = vmatpush3.bf16.msra.mxu1 %v2941_v19 }
0x10f5   :  { %2943 = vmatprep.subr.bf16.mxu1 %v3214_v0 }
0x10f8   :  { %2945 = vmatpush3.bf16.msra.mxu1 %v2944_v21 }
0x10f9   :  { %2946 = vmatprep.subr.bf16.mxu1 %v3214_v0 }
0x10fc   :  { %2948 = vmatpush3.bf16.msra.mxu1 %v2947_v24 }
0x10fd   :  { %2949 = vmatprep.subr.bf16.mxu1 %v3214_v0 }
0x1100   :  { %2951 = vmatpush3.bf16.msra.mxu1 %v2950_v31 }
0x1101   :  { %2952 = vmatprep.subr.bf16.mxu1 %v3214_v0 }
0x1104   :  { %2954 = vmatpush3.bf16.msra.mxu1 %v2953_v34 }
0x1105   :  { %2955 = vmatprep.subr.bf16.mxu1 %v3214_v0 }
0x1108   :  { %2957 = vmatpush3.bf16.msra.mxu1 %v2956_v37  ;;  %v1571_v37 = vld [vmem:[#allocation8 + $0x3b0] sm:$0xff] }
0x1109   :  { %2958 = vmatprep.subr.bf16.mxu1 %v3214_v0  ;;  %v2998_v39 = vpack.c.bf16 %v1572_v38, %v1571_v37 }
0x110c   :  { %2960 = vmatpush3.bf16.msra.mxu1 %v2959_v40  ;;  %v1573_v40 = vld [vmem:[#allocation8 + $0x3c0] sm:$0xff] }
0x110d   :  { %2961 = vmatprep.subr.bf16.mxu1 %v3214_v0  ;;  %v3001_v42 = vpack.c.bf16 %v1574_v41, %v1573_v40 }
0x1110   :  { %2963 = vmatpush3.bf16.msra.mxu1 %v2962_v43  ;;  %v1575_v43 = vld [vmem:[#allocation8 + $0x3d0] sm:$0xff] }
0x1111   :  { %2988 = vmatprep.subr.bf16.mxu1 %v3214_v0  ;;  %v3004_v45 = vpack.c.bf16 %v1576_v44, %v1575_v43 }
0x11c6   :  { %v1287_v7 = vpop.f32.mrb[10].mxu1 }
0x11c7   :  { %v1291_v8 = vmax.f32 %v1287_v7, 0.0  ;;  %v2464_v9 = vpop.f32.mrb[11].mxu1  ;;  %v1413_v7 = vrot.slane %v1364_v6, %v3352_v10 }
0x11c9   :  { %2498 = vmatmul.mubr.f32.vlgmr.msra.gmra.mrb[12].mxu0 %v1291_v8 }
0x11ca   :  { %2567 = vmatprep.mubr.msk.f32.mxu0 %vm3215_vm0, %v3216_v1  ;;  %2966 = vmatpush3.bf16.msra.mxu0 %v2965_v47  ;;  %v1578_v47 = vld [vmem:[#allocation8 + $0x3e8] sm:$0xff] }
0x11cb   :  { %2967 = vmatprep.subr.bf16.mxu0 %v3214_v0  ;;  %v3007_v48 = vpack.c.bf16 %v1578_v47, %v1577_v46 }
0x11ce   :  { %2969 = vmatpush3.bf16.msra.mxu0 %v2968_v49  ;;  %v1579_v49 = vld [vmem:[#allocation8 + $0x3f0] sm:$0xff] }
0x11cf   :  { %2970 = vmatprep.subr.bf16.mxu0 %v3214_v0  ;;  %v3010_v51 = vpack.c.bf16 %v1580_v50, %v1579_v49 }
0x11d2   :  { %2972 = vmatpush3.bf16.msra.mxu0 %v2971_v52  ;;  %v1582_v52 = vld [vmem:[#allocation10 + $0x380] sm:$0xff] }
0x11d3   :  { %2973 = vmatprep.subr.bf16.mxu0 %v3214_v0 }
0x11d6   :  { %2975 = vmatpush3.bf16.msra.mxu0 %v2974_v55  ;;  %v3013_v55 = vpack.c.bf16 %v1583_v53, %v1582_v52 }
0x11d7   :  { %2976 = vmatprep.subr.bf16.mxu0 %v3214_v0 }
0x11da   :  { %2978 = vmatpush3.bf16.msra.mxu0 %v2977_v58  ;;  %v1586_v58 = vld [vmem:[#allocation10 + $0x3a0] sm:$0xff] }
0x11db   :  { %2979 = vmatprep.subr.bf16.mxu0 %v3214_v0  ;;  %v3019_v60 = vpack.c.bf16 %v1587_v59, %v1586_v58 }
0x11de   :  { %2981 = vmatpush3.bf16.msra.mxu0 %v2980_v61  ;;  %v1588_v61 = vld [vmem:[#allocation10 + $0x3b0] sm:$0xff] }
0x11df   :  { %2982 = vmatprep.subr.bf16.mxu0 %v3214_v0  ;;  %v3022_v63 = vpack.c.bf16 %v1589_v62, %v1588_v61 }
0x11e2   :  { %2984 = vmatpush3.bf16.msra.mxu0 %v2983_v2  ;;  %v1590_v2 = vld [vmem:[#allocation10 + $0x3c0] sm:$0xff] }
0x11e3   :  { %2985 = vmatprep.subr.bf16.mxu0 %v3214_v0 }
0x11e6   :  { %2987 = vmatpush3.bf16.msra.mxu0 %v2986_v18  ;;  %v1612_v18 = vrot.slane %v1563_v17, %v3352_v10 }
0x11e7   :  { %3012 = vmatprep.subr.bf16.mxu0 %v3214_v0 }
0x129c   :  { %v1358_v11 = vpop.f32.mrb[12].mxu0 }
0x129d   :  { %v1359_v13 = vadd.f32 %v1358_v11, %v3493_v29  ;;  %v2499_v14 = vpop.f32.mrb[13].mxu0  ;;  %v1418_v11 = vrot.slane %v1364_v6, %v3354_v12  ;;  %v1593_v6 = vld [vmem:[#allocation10 + $0x3d8] sm:$0xff] }
0x129f   :  { %v3525_v16 = vmax.f32 %v1359_v13, 0.0 }
0x12a1   :  { %1399 = vadd.xlane.f32.xlu0 %v3525_v16 }
0x132e   :  { %v1400_v29 = vpop.xlane.xlu0 %1399 }
0x132f   :  { %v1401_v25 = vmul.f32 0.0078125, %v1400_v29 }
0x1331   :  { %v3532_v26 = vsub.f32 %v3525_v16, %v1401_v25  ;;  %v1565_v25 = vld [vmem:[#allocation8 + $0x380] sm:$0xff] }
0x1333   :  { %v1403_v27 = vmul.f32 %v3532_v26, %v3532_v26 }
0x1335   :  { %1404 = vadd.xlane.f32.xlu1 %v1403_v27  ;;  %v1567_v27 = vld [vmem:[#allocation8 + $0x390] sm:$0xff] }
0x1336   :  { %v2992_v31 = vpack.c.bf16 %v1568_v30, %v1567_v27 }
0x13c2   :  { %v1405_v3 = vpop.xlane.xlu1 %1404 }
0x13c3   :  { %v1406_v4 = vmul.f32 0.0078125, %v1405_v3  ;;  %v1591_v3 = vld [vmem:[#allocation10 + $0x3c8] sm:$0xff] }
0x13c5   :  { %v1407_v5 = vadd.f32 1e-05, %v1406_v4  ;;  %v3025_v4 = vpack.c.bf16 %v1591_v3, %v1590_v2 }
0x13c7   :  { %3061 = vrsqrt.f32 %v1407_v5  ;;  %v1592_v5 = vld [vmem:[#allocation10 + $0x3d0] sm:$0xff] }
0x13d1   :  { %v3062_v8 = vpop.eup %3061 }
0x13d2   :  { %v1409_v9 = vmul.f32 %v3062_v8, %v3532_v26  ;;  %v1566_v26 = vld [vmem:[#allocation8 + $0x388] sm:$0xff]  ;;  %v1594_v8 = vld [vmem:[#allocation10 + $0x3e0] sm:$0xff] }
0x13d3   :  { %v2989_v28 = vpack.c.bf16 %v1566_v26, %v1565_v25  ;;  %v1597_v25 = vld [vmem:[#allocation10 + $0x3f8] sm:$0xff] }
0x13d4   :  { %v1414_v13 = vmul.f32 %v1413_v7, %v1409_v9  ;;  %v3028_v7 = vpack.c.bf16 %v1593_v6, %v1592_v5  ;;  %v1595_v9 = vld [vmem:[#allocation10 + $0x3e8] sm:$0xff] }
0x13d6   :  { %v1419_v14 = vadd.f32 %v1418_v11, %v1414_v13  ;;  %v3031_v11 = vpack.c.bf16 %v1595_v9, %v1594_v8 }
0x13d8   :  { %2533 = vmatmul.mubr.f32.vlgmr.msra.gmra.mrb[12].mxu1 %v1419_v14 }
0x13d9   :  { %2602 = vmatprep.mubr.msk.f32.mxu1 %vm3215_vm0, %v3216_v1  ;;  %2990 = vmatpush3.bf16.msra.mxu1 %v2989_v28 }
0x13da   :  { %2991 = vmatprep.subr.bf16.mxu1 %v3214_v0 }
0x13dd   :  { %2993 = vmatpush3.bf16.msra.mxu1 %v2992_v31 }
0x13de   :  { %2994 = vmatprep.subr.bf16.mxu1 %v3214_v0 }
0x14ab   :  { %v1486_v19 = vpop.f32.mrb[12].mxu1 }
0x14ac   :  { %v1490_v20 = vmax.f32 %v1486_v19, 0.0  ;;  %v2534_v21 = vpop.f32.mrb[13].mxu1 }
0x14ad   :  { %v1617_v21 = vrot.slane %v1563_v17, %v3354_v12 }
0x14ae   :  { %2568 = vmatmul.mubr.f32.vlgmr.msra.gmra.mrb[14].mxu0 %v1490_v20 }
0x14af   :  { %2637 = vmatprep.mubr.msk.f32.mxu0 %vm3215_vm0, %v3216_v1  ;;  %v2995_v1 = vpack.c.bf16 %v1570_v33, %v1569_v32  ;;  %3014 = vmatpush3.bf16.msra.mxu0 %v3013_v55 }
0x14b0   :  { %3015 = vmatprep.subr.bf16.mxu0 %v3214_v0 }
0x14b1   :  { %2996 = vmatpush3.bf16.msra.mxu1 %v2995_v1 }
0x14b2   :  { %2997 = vmatprep.subr.bf16.mxu1 %v3214_v0 }
0x14b3   :  { %3017 = vmatpush3.bf16.msra.mxu0 %v3016_v57 }
0x14b4   :  { %3018 = vmatprep.subr.bf16.mxu0 %v3214_v0 }
0x14b5   :  { %2999 = vmatpush3.bf16.msra.mxu1 %v2998_v39 }
0x14b6   :  { %3000 = vmatprep.subr.bf16.mxu1 %v3214_v0 }
0x14b7   :  { %3020 = vmatpush3.bf16.msra.mxu0 %v3019_v60 }
0x14b8   :  { %3021 = vmatprep.subr.bf16.mxu0 %v3214_v0 }
0x14b9   :  { %3002 = vmatpush3.bf16.msra.mxu1 %v3001_v42 }
0x14ba   :  { %3003 = vmatprep.subr.bf16.mxu1 %v3214_v0 }
0x14bb   :  { %3023 = vmatpush3.bf16.msra.mxu0 %v3022_v63 }
0x14bc   :  { %3024 = vmatprep.subr.bf16.mxu0 %v3214_v0 }
0x14bd   :  { %3005 = vmatpush3.bf16.msra.mxu1 %v3004_v45 }
0x14be   :  { %3006 = vmatprep.subr.bf16.mxu1 %v3214_v0 }
0x14bf   :  { %3026 = vmatpush3.bf16.msra.mxu0 %v3025_v4 }
0x14c0   :  { %3027 = vmatprep.subr.bf16.mxu0 %v3214_v0 }
0x14c1   :  { %3008 = vmatpush3.bf16.msra.mxu1 %v3007_v48 }
0x14c2   :  { %3009 = vmatprep.subr.bf16.mxu1 %v3214_v0 }
0x14c3   :  { %3029 = vmatpush3.bf16.msra.mxu0 %v3028_v7 }
0x14c4   :  { %3030 = vmatprep.subr.bf16.mxu0 %v3214_v0 }
0x14c5   :  { %3011 = vmatpush3.bf16.msra.mxu1 %v3010_v51 }
0x14c7   :  { %3032 = vmatpush3.bf16.msra.mxu0 %v3031_v11 }
0x14c8   :  { %3033 = vmatprep.subr.bf16.mxu0 %v3214_v0 }
0x1581   :  { %v1557_v22 = vpop.f32.mrb[14].mxu0 }
0x1582   :  { %v1558_v23 = vadd.f32 %v1557_v22, %v3525_v16  ;;  %v2569_v24 = vpop.f32.mrb[15].mxu0 }
0x1583   :  { %v1596_v24 = vld [vmem:[#allocation10 + $0x3f0] sm:$0xff] }
0x1584   :  { %v3557_v29 = vmax.f32 %v1558_v23, 0.0  ;;  %v3034_v26 = vpack.c.bf16 %v1597_v25, %v1596_v24 }
0x1586   :  { %1598 = vadd.xlane.f32.xlu0 %v3557_v29  ;;  %3035 = vmatpush3.bf16.msra.mxu0 %v3034_v26 }
0x1613   :  { %v1599_v16 = vpop.xlane.xlu0 %1598 }
0x1614   :  { %v1600_v34 = vmul.f32 0.0078125, %v1599_v16 }
0x1616   :  { %v3564_v35 = vsub.f32 %v3557_v29, %v1600_v34 }
0x1618   :  { %v1602_v36 = vmul.f32 %v3564_v35, %v3564_v35 }
0x161a   :  { %1603 = vadd.xlane.f32.xlu1 %v1602_v36 }
0x16a7   :  { %v1604_v13 = vpop.xlane.xlu1 %1603 }
0x16a8   :  { %v1605_v14 = vmul.f32 0.0078125, %v1604_v13 }
0x16aa   :  { %v1606_v15 = vadd.f32 1e-05, %v1605_v14 }
0x16ac   :  { %3063 = vrsqrt.f32 %v1606_v15 }
0x16b6   :  { %v3064_v19 = vpop.eup %3063 }
0x16b7   :  { %v1608_v20 = vmul.f32 %v3064_v19, %v3564_v35 }
0x16b9   :  { %v1613_v22 = vmul.f32 %v1612_v18, %v1608_v20 }
0x16bb   :  { %v1618_v23 = vadd.f32 %v1617_v21, %v1613_v22 }
0x16bd   :  { %2603 = vmatmul.mubr.f32.vlgmr.msra.gmra.mrb[14].mxu1 %v1618_v23 }
0x1790   :  { %v1685_v0 = vpop.f32.mrb[14].mxu1 }
0x1791   :  { %v1689_v27 = vmax.f32 %v1685_v0, 0.0  ;;  %v2604_v28 = vpop.f32.mrb[15].mxu1 }
0x1793   :  { %2638 = vmatmul.mubr.f32.vlgmr.msra.gmra.mrb[16].mxu0 %v1689_v27 }
0x1866   :  { %v1756_v30 = vpop.f32.mrb[16].mxu0 }
0x1867   :  { %v1757_v10 = vadd.f32 %v1756_v30, %v3557_v29  ;;  %v2639_v31 = vpop.f32.mrb[17].mxu0 }
0x1869   :  { %v1760_v32 = vmax.f32 %v1757_v10, 0.0 }
0x186b   :  { %1761 = vst [vmem:[#allocation11] sm:$0xff] %v1760_v32 }
0x186c   :  { %3186 = shalt.err (!%p3183_p2)
}
0x186d   :  { %s3187_s7 = scalar_lea.hbm %s3600_s5, 128 }
0x186e   :  { %p3188_p3 = scmp.ne.s32.totalorder %s3600_s5, %s3187_s7  ;;  %p3191_p4 = scmp.lt.u32.totalorder %s3187_s7, %s3600_s5 }
0x1870   :  { %p3193_p5 = pnand %p3191_p4, %p3188_p3 }
0x1872   :  { %3196 = shalt.err (!%p3193_p5)
}
0x1873   :  { %1771 = dma.vmem_to_hbm [thread:$0]  %s1769_s28, 128, %s3600_s5, [#allocation4]  }
0x1874   :  { %3203 = dma.done.wait [#allocation4], 128  }
0x1875   :  { %3204 = vsyncadd [#allocation4], 4294967168 }
0x1876   :  { %1775 = vsyncpa [#allocation3], 1 }
0x1877   :  { %1776 = vsyncpa [#allocation6], 1 }
0x1878   :  { %1777 = vsyncpa [#allocation9], 1 }
0x1879   :  { %1778 = vsyncpa [#allocation4], 1 }

</bundles_post_ra>
